<compile_context>
chip_gen: v7x
topology: tpu7x:2x2x1
jax: 0.10.0
libtpu: 0.0.40
codegen_flags: <defaults>
</compile_context>

<pallas_src>
import jax
import jax.numpy as jnp
from jax import lax
from jax.experimental import pallas as pl
from jax.experimental.pallas import tpu as pltpu


# --------------------------------------------------------------------------
# Kernel
# --------------------------------------------------------------------------
def _make_kernel(*, H, W, C, TH, c_aligned, compute_dtype):
    """Build the kernel for one (batch, row-tile) grid step.

    x_ref  : (H, W, C)      whole un-padded NHWC image, resident in VMEM
    w1_ref : (3, 3C, C)     im2col weights per dw   (aligned path, C%128==0)
             (3, 3, C, C)   HWIO weights            (fallback path)
    sc/sh  : (1, C)         folded BN scale / shift (include conv biases)
    w2_ref : (C, C)         1x1 conv weights (Cin, Cout)
    o_ref  : (TH, W, C)     output row-tile
    """
    M = TH * W

    def kernel(x_ref, w1_ref, sc1_ref, sh1_ref, w2_ref, sc2_ref, sh2_ref, o_ref):
        h = pl.program_id(1)
        row0 = pl.multiple_of(h * TH, TH)

        # Aligned interior tile (f32): feeds the conv AND the residual add.
        core = x_ref[pl.ds(row0, TH), :, :]                      # (TH, W, C)

        # Halo rows from the resident image; zero at the image boundary.
        top_i = jnp.maximum(row0 - 1, 0)
        bot_i = jnp.minimum(row0 + TH, H - 1)
        top = x_ref[pl.ds(top_i, 1), :, :]                       # (1, W, C)
        bot = x_ref[pl.ds(bot_i, 1), :, :]                       # (1, W, C)
        top = jnp.where(row0 > 0, top, jnp.zeros_like(top))
        bot = jnp.where(row0 + TH < H, bot, jnp.zeros_like(bot))

        # First ReLU (f32), then cast once to the matmul compute dtype; pad W.
        a_rows = jnp.maximum(jnp.concatenate([top, core, bot], axis=0),
                             0.0).astype(compute_dtype)          # (TH+2, W, C)
        zcol = jnp.zeros((TH + 2, 1, C), compute_dtype)
        a = jnp.concatenate([zcol, a_rows, zcol], axis=1)        # (TH+2, W+2, C)

        # --- Conv 3x3 (accumulate in f32 on the MXU) ---
        acc = None
        if c_aligned:
            # One lane-aligned im2col matmul per dw: (M, 3C) @ (3C, C).
            for dw in range(3):
                slab = a[:, dw:dw + W, :]                        # (TH+2, W, C)
                p = jnp.concatenate([slab[dh:dh + TH] for dh in range(3)],
                                    axis=-1).reshape(M, 3 * C)
                d = jnp.dot(p, w1_ref[dw], preferred_element_type=jnp.float32)
                acc = d if acc is None else acc + d
        else:
            # Unaligned / small C: 9 accumulated (M, C) @ (C, C) matmuls,
            # no lane-axis concatenation.
            for dh in range(3):
                for dw in range(3):
                    tap = a[dh:dh + TH, dw:dw + W, :].reshape(M, C)
                    d = jnp.dot(tap, w1_ref[dh, dw],
                                preferred_element_type=jnp.float32)
                    acc = d if acc is None else acc + d

        # --- folded BN1 + ReLU, in f32 ---
        y = jnp.maximum(acc * sc1_ref[...] + sh1_ref[...], 0.0)

        # --- Conv 1x1 (channel matmul) + folded BN2 ---
        z = jnp.dot(y.astype(compute_dtype), w2_ref[...],
                    preferred_element_type=jnp.float32)           # (M, C) f32
        z = z * sc2_ref[...] + sh2_ref[...]

        # --- residual add with the ORIGINAL (pre-ReLU) interior, f32 ---
        o_ref[...] = (core + z.reshape(TH, W, C)).astype(o_ref.dtype)

    return kernel


# --------------------------------------------------------------------------
# Tiling / VMEM configuration
# --------------------------------------------------------------------------
def _vmem_config():
    """Generation-aware (budget for the counted working set, scoped-VMEM limit)."""
    try:
        cap = int(getattr(pltpu.get_tpu_info(), "vmem_capacity_bytes", 0)) or 0
    except Exception:
        cap = 0
    if cap <= 0:                       # unknown chip: safe on v5e/v6e/v7x
        return 16 << 20, 48 << 20
    budget = min(max(cap // 4, 8 << 20), 32 << 20)
    vmem_limit = min(max((cap * 3) // 4, 32 << 20), 100 << 20)
    return budget, vmem_limit


def _choose_tile_rows(N, H, W, C, cdt_size, budget_bytes):
    """Largest divisor of H whose per-step working set fits the budget; keeps
    at least 2 grid steps when N == 1 so both v7x TensorCores get work."""
    fixed = 2 * H * W * C * 4                        # resident image block (x2 bufs)
    fixed += 2 * (9 * C * C + C * C) * cdt_size      # conv weights (x2 bufs)
    fixed += 2 * 4 * C * 4                           # folded BN scale/shift
    avail = budget_bytes - fixed

    def est(th):
        m = th * W
        b = th * W * C * 4                           # residual interior copy (f32)
        b += (th + 2) * (W + 2) * C * cdt_size       # ReLU'd padded window (cdt)
        b += 2 * m * 3 * C * cdt_size                # im2col slabs in flight (cdt)
        b += 2 * m * C * 4                           # conv1/conv2 f32 results
        b += 2 * th * W * C * 4                      # output block (x2 bufs)
        return b

    divisors = [d for d in range(1, H + 1) if H % d == 0]
    fitting = [d for d in divisors if est(d) <= avail] or [divisors[0]]
    if N < 2:
        multi = [d for d in fitting if H // d >= 2]
        if multi:
            return max(multi)
    return max(fitting)


# --------------------------------------------------------------------------
# Wrappers
# --------------------------------------------------------------------------
def residual_block_pallas_nhwc(x_nhwc, folded, *, compute_dtype=jnp.bfloat16,
                               tile_rows=None):
    """NHWC-native entry point (no layout transposes). x_nhwc: (N, H, W, C)."""
    w1_hwio, s1, sh1, w2_mat, s2, sh2 = folded
    N, H, W, C = x_nhwc.shape
    cdt_size = jnp.dtype(compute_dtype).itemsize
    c_aligned = (C % 128 == 0)

    budget, vmem_limit = _vmem_config()
    th = tile_rows or _choose_tile_rows(N, H, W, C, cdt_size, budget)
    num_h = H // th

    if c_aligned:
        # One (3C, C) im2col weight matrix per dw; rows ordered (dh, cin).
        w1 = jnp.transpose(w1_hwio, (1, 0, 2, 3)).reshape(3, 3 * C, C)
        w1 = w1.astype(compute_dtype)
        w1_spec = pl.BlockSpec((3, 3 * C, C), lambda b, h: (0, 0, 0))
    else:
        w1 = w1_hwio.astype(compute_dtype)               # (dh, dw, cin, cout)
        w1_spec = pl.BlockSpec((3, 3, C, C), lambda b, h: (0, 0, 0, 0))
    w2 = w2_mat.astype(compute_dtype)
    sc1 = s1.reshape(1, C).astype(jnp.float32)
    sh1c = sh1.reshape(1, C).astype(jnp.float32)
    sc2 = s2.reshape(1, C).astype(jnp.float32)
    sh2c = sh2.reshape(1, C).astype(jnp.float32)

    kernel = _make_kernel(H=H, W=W, C=C, TH=th, c_aligned=c_aligned,
                          compute_dtype=compute_dtype)

    return pl.pallas_call(
        kernel,
        out_shape=jax.ShapeDtypeStruct((N, H, W, C), x_nhwc.dtype),
        grid=(N, num_h),
        in_specs=[
            # Whole un-padded image: block index constant across the h axis,
            # so it stays VMEM-resident (one HBM read of the activations).
            pl.BlockSpec((None, H, W, C), lambda b, h: (b, 0, 0, 0)),
            w1_spec,
            pl.BlockSpec((1, C), lambda b, h: (0, 0)),
            pl.BlockSpec((1, C), lambda b, h: (0, 0)),
            pl.BlockSpec((C, C), lambda b, h: (0, 0)),
            pl.BlockSpec((1, C), lambda b, h: (0, 0)),
            pl.BlockSpec((1, C), lambda b, h: (0, 0)),
        ],
        out_specs=pl.BlockSpec((None, th, W, C), lambda b, h: (b, h, 0, 0)),
        compiler_params=pltpu.CompilerParams(
            dimension_semantics=("parallel", "parallel"),
            vmem_limit_bytes=int(vmem_limit)),
    )(x_nhwc, w1, sc1, sh1c, w2, sc2, sh2c)


def residual_block_pallas(x_nchw, folded, **kwargs):
    """PyTorch-interface wrapper: (N, C, H, W) in, (N, C, H, W) out."""
    x_nhwc = jnp.transpose(x_nchw, (0, 2, 3, 1))
    out_nhwc = residual_block_pallas_nhwc(x_nhwc, folded, **kwargs)
    return jnp.transpose(out_nhwc, (0, 3, 1, 2))


# --------------------------------------------------------------------------
# Parameters + pure-JAX reference
# --------------------------------------------------------------------------
def make_params(key, C, eps=1e-5):
    """Deterministic synthetic parameters (PyTorch shapes), then fold BN."""
    k1, k2, k3, k4, k5, k6 = jax.random.split(key, 6)
    w1_oihw = jax.random.normal(k1, (C, C, 3, 3), jnp.float32) * 0.1
    b1 = jax.random.normal(k2, (C,), jnp.float32) * 0.1
    w2_oihw = jax.random.normal(k3, (C, C, 1, 1), jnp.float32) * 0.1
    b2 = jax.random.normal(k4, (C,), jnp.float32) * 0.1
    gamma1 = jnp.ones((C,), jnp.float32)
    beta1 = jnp.zeros((C,), jnp.float32)
    mean1 = jax.random.normal(k5, (C,), jnp.float32) * 0.05
    var1 = jnp.ones((C,), jnp.float32)
    gamma2 = jnp.ones((C,), jnp.float32)
    beta2 = jnp.zeros((C,), jnp.float32)
    mean2 = jax.random.normal(k6, (C,), jnp.float32) * 0.05
    var2 = jnp.ones((C,), jnp.float32)

    # Fold conv bias + eval-mode BN into per-channel scale/shift.
    s1 = gamma1 / jnp.sqrt(var1 + eps)
    sh1 = (b1 - mean1) * s1 + beta1
    s2 = gamma2 / jnp.sqrt(var2 + eps)
    sh2 = (b2 - mean2) * s2 + beta2

    w1_hwio = jnp.transpose(w1_oihw, (2, 3, 1, 0))       # (3, 3, Cin, Cout)
    w2_mat = jnp.transpose(w2_oihw[:, :, 0, 0], (1, 0))  # (Cin, Cout)

    folded = (w1_hwio, s1, sh1, w2_mat, s2, sh2)
    torch_params = (w1_oihw, b1, gamma1, beta1, mean1, var1,
                    w2_oihw, b2, gamma2, beta2, mean2, var2, eps)
    return folded, torch_params


def reference_jax(x, torch_params):
    """Pure-JAX NCHW reference matching the PyTorch module in eval mode."""
    (w1, b1, g1, be1, m1, v1, w2, b2, g2, be2, m2, v2, eps) = torch_params
    dn = ('NCHW', 'OIHW', 'NCHW')
    a = jnp.maximum(x, 0.0)
    y = lax.conv_general_dilated(a, w1, (1, 1), 'SAME', dimension_numbers=dn,
                                 precision=lax.Precision.HIGHEST) \
        + b1[None, :, None, None]
    y = (y - m1[None, :, None, None]) / jnp.sqrt(v1 + eps)[None, :, None, None] \
        * g1[None, :, None, None] + be1[None, :, None, None]
    y = jnp.maximum(y, 0.0)
    z = lax.conv_general_dilated(y, w2, (1, 1), 'SAME', dimension_numbers=dn,
                                 precision=lax.Precision.HIGHEST) \
        + b2[None, :, None, None]
    z = (z - m2[None, :, None, None]) / jnp.sqrt(v2 + eps)[None, :, None, None] \
        * g2[None, :, None, None] + be2[None, :, None, None]
    return x + z


# --------------------------------------------------------------------------
# Demo / correctness check
# --------------------------------------------------------------------------
if __name__ == "__main__":
    key = jax.random.PRNGKey(0)
    kx, kp, kx2, kp2 = jax.random.split(key, 4)

    # ---- small-C config (module demo size): exercises the unaligned-C path ----
    N, C, H, W = 2, 4, 16, 16
    x = jax.random.normal(kx, (N, C, H, W), jnp.float32)
    folded, torch_params = make_params(kp, C)
    ref = jax.block_until_ready(reference_jax(x, torch_params))

    out_f32 = jax.block_until_ready(
        residual_block_pallas(x, folded, compute_dtype=jnp.float32))
    assert out_f32.shape == (N, C, H, W)
    assert jnp.max(jnp.abs(out_f32 - ref)) < 1e-3, "f32 mismatch vs reference"

    out_bf16 = jax.block_until_ready(
        residual_block_pallas(x, folded, compute_dtype=jnp.bfloat16))
    assert out_bf16.shape == (N, C, H, W)
    assert jnp.max(jnp.abs(out_bf16 - ref)) < 3e-2, "bf16 mismatch vs reference"

    # ---- lane-aligned config (C % 128 == 0): exercises the im2col matmul path ----
    N2, C2, H2, W2 = 2, 128, 8, 8
    x2 = jax.random.normal(kx2, (N2, C2, H2, W2), jnp.float32)
    folded2, torch_params2 = make_params(kp2, C2)
    ref2 = jax.block_until_ready(reference_jax(x2, torch_params2))

    out2 = jax.block_until_ready(
        residual_block_pallas(x2, folded2, compute_dtype=jnp.bfloat16))
    assert out2.shape == (N2, C2, H2, W2)
    assert jnp.max(jnp.abs(out2 - ref2)) < 1e-1, "bf16 mismatch vs reference (C=128)"

    print("KERNEL_OK")
</pallas_src>

<mosaic_0001>
module attributes {stable_mosaic.version = 11 : i64} {
  func.func @kernel(%arg0: i32, %arg1: i32, %arg2: memref<1x16x16x4xf32, #tpu.memory_space<vmem>>, %arg3: memref<3x3x4x4xf32, #tpu.memory_space<vmem>>, %arg4: memref<1x4xf32, #tpu.memory_space<vmem>>, %arg5: memref<1x4xf32, #tpu.memory_space<vmem>>, %arg6: memref<4x4xf32, #tpu.memory_space<vmem>>, %arg7: memref<1x4xf32, #tpu.memory_space<vmem>>, %arg8: memref<1x4xf32, #tpu.memory_space<vmem>>, %arg9: memref<1x16x16x4xf32, #tpu.memory_space<vmem>>) attributes {dimension_semantics = [#tpu.dimension_semantics<parallel>, #tpu.dimension_semantics<parallel>], iteration_bounds = array<i64: 2, 1>, scalar_prefetch = 0 : i64, scratch_operands = 0 : i64, tpu.core_type = #tpu.core_type<tc>, window_params = [{transform_indices = @transform_0, window_bounds = array<i64: 1, 16, 16, 4>}, {pipeline_mode = #tpu.pipeline_mode<synchronous>, transform_indices = @transform_1, window_bounds = array<i64: 3, 3, 4, 4>}, {pipeline_mode = #tpu.pipeline_mode<synchronous>, transform_indices = @transform_2, window_bounds = array<i64: 1, 4>}, {pipeline_mode = #tpu.pipeline_mode<synchronous>, transform_indices = @transform_3, window_bounds = array<i64: 1, 4>}, {pipeline_mode = #tpu.pipeline_mode<synchronous>, transform_indices = @transform_4, window_bounds = array<i64: 4, 4>}, {pipeline_mode = #tpu.pipeline_mode<synchronous>, transform_indices = @transform_5, window_bounds = array<i64: 1, 4>}, {pipeline_mode = #tpu.pipeline_mode<synchronous>, transform_indices = @transform_6, window_bounds = array<i64: 1, 4>}, {transform_indices = @transform_7, window_bounds = array<i64: 1, 16, 16, 4>}]} {
    %c16_i32 = arith.constant 16 : i32
    %0 = arith.muli %arg1, %c16_i32 : i32
    %1 = tpu.assume_multiple %0, 16 : i32
    %c0 = arith.constant 0 : index
    %2 = arith.index_cast %1 : i32 to index
    %c0_0 = arith.constant 0 : index
    %c0_1 = arith.constant 0 : index
    %3 = vector.load %arg2[%c0, %2, %c0_0, %c0_1] : memref<1x16x16x4xf32, #tpu.memory_space<vmem>>, vector<1x16x16x4xf32>
    %4 = vector.shape_cast %3 : vector<1x16x16x4xf32> to vector<16x16x4xf32>
    %c1_i32 = arith.constant 1 : i32
    %5 = arith.subi %1, %c1_i32 : i32
    %c0_i32 = arith.constant 0 : i32
    %6 = arith.maxsi %5, %c0_i32 : i32
    %c16_i32_2 = arith.constant 16 : i32
    %7 = arith.addi %1, %c16_i32_2 : i32
    %c15_i32 = arith.constant 15 : i32
    %8 = arith.minsi %7, %c15_i32 : i32
    %c0_3 = arith.constant 0 : index
    %9 = arith.index_cast %6 : i32 to index
    %c0_4 = arith.constant 0 : index
    %c0_5 = arith.constant 0 : index
    %10 = vector.load %arg2[%c0_3, %9, %c0_4, %c0_5] : memref<1x16x16x4xf32, #tpu.memory_space<vmem>>, vector<1x1x16x4xf32>
    %11 = vector.shape_cast %10 : vector<1x1x16x4xf32> to vector<1x16x4xf32>
    %c0_6 = arith.constant 0 : index
    %12 = arith.index_cast %8 : i32 to index
    %c0_7 = arith.constant 0 : index
    %c0_8 = arith.constant 0 : index
    %13 = vector.load %arg2[%c0_6, %12, %c0_7, %c0_8] : memref<1x16x16x4xf32, #tpu.memory_space<vmem>>, vector<1x1x16x4xf32>
    %14 = vector.shape_cast %13 : vector<1x1x16x4xf32> to vector<1x16x4xf32>
    %c0_i32_9 = arith.constant 0 : i32
    %15 = arith.cmpi sgt, %1, %c0_i32_9 : i32
    %cst = arith.constant 0.000000e+00 : f32
    %16 = vector.broadcast %cst : f32 to vector<1x16x4xf32>
    %17 = arith.select %15, %11, %16 : vector<1x16x4xf32>
    %c16_i32_10 = arith.constant 16 : i32
    %18 = arith.addi %1, %c16_i32_10 : i32
    %c16_i32_11 = arith.constant 16 : i32
    %19 = arith.cmpi slt, %18, %c16_i32_11 : i32
    %cst_12 = arith.constant 0.000000e+00 : f32
    %20 = vector.broadcast %cst_12 : f32 to vector<1x16x4xf32>
    %21 = arith.select %19, %14, %20 : vector<1x16x4xf32>
    %22 = tpu.concatenate %17, %4, %21 in 0 : vector<1x16x4xf32>, vector<16x16x4xf32>, vector<1x16x4xf32> -> vector<18x16x4xf32>
    %cst_13 = arith.constant 0.000000e+00 : f32
    %23 = vector.broadcast %cst_13 : f32 to vector<18x16x4xf32>
    %24 = arith.maximumf %22, %23 : vector<18x16x4xf32>
    %cst_14 = arith.constant 0.000000e+00 : f32
    %25 = vector.broadcast %cst_14 : f32 to vector<18x1x4xf32>
    %26 = tpu.concatenate %25, %24, %25 in 1 : vector<18x1x4xf32>, vector<18x16x4xf32>, vector<18x1x4xf32> -> vector<18x18x4xf32>
    %27 = vector.extract_strided_slice %26 {offsets = [0, 0, 0], sizes = [16, 16, 4], strides = [1, 1, 1]} : vector<18x18x4xf32> to vector<16x16x4xf32>
    %28 = vector.shape_cast %27 : vector<16x16x4xf32> to vector<256x4xf32>
    %c0_15 = arith.constant 0 : index
    %c0_16 = arith.constant 0 : index
    %c0_17 = arith.constant 0 : index
    %c0_18 = arith.constant 0 : index
    %29 = vector.load %arg3[%c0_15, %c0_16, %c0_17, %c0_18] : memref<3x3x4x4xf32, #tpu.memory_space<vmem>>, vector<1x1x4x4xf32>
    %30 = vector.shape_cast %29 : vector<1x1x4x4xf32> to vector<4x4xf32>
    %cst_19 = arith.constant dense<0.000000e+00> : vector<256x4xf32>
    %31 = tpu.matmul %28, %30, %cst_19 {dimension_numbers = #tpu.dot_dimension_numbers<[1], [0], [0], [1], [0, 0, 1, 1], [], []>} : vector<256x4xf32>, vector<4x4xf32>, vector<256x4xf32> -> vector<256x4xf32>
    %32 = vector.extract_strided_slice %26 {offsets = [0, 1, 0], sizes = [16, 16, 4], strides = [1, 1, 1]} : vector<18x18x4xf32> to vector<16x16x4xf32>
    %33 = vector.shape_cast %32 : vector<16x16x4xf32> to vector<256x4xf32>
    %c0_20 = arith.constant 0 : index
    %c1 = arith.constant 1 : index
    %c0_21 = arith.constant 0 : index
    %c0_22 = arith.constant 0 : index
    %34 = vector.load %arg3[%c0_20, %c1, %c0_21, %c0_22] : memref<3x3x4x4xf32, #tpu.memory_space<vmem>>, vector<1x1x4x4xf32>
    %35 = vector.shape_cast %34 : vector<1x1x4x4xf32> to vector<4x4xf32>
    %cst_23 = arith.constant dense<0.000000e+00> : vector<256x4xf32>
    %36 = tpu.matmul %33, %35, %cst_23 {dimension_numbers = #tpu.dot_dimension_numbers<[1], [0], [0], [1], [0, 0, 1, 1], [], []>} : vector<256x4xf32>, vector<4x4xf32>, vector<256x4xf32> -> vector<256x4xf32>
    %37 = arith.addf %31, %36 : vector<256x4xf32>
    %38 = vector.extract_strided_slice %26 {offsets = [0, 2, 0], sizes = [16, 16, 4], strides = [1, 1, 1]} : vector<18x18x4xf32> to vector<16x16x4xf32>
    %39 = vector.shape_cast %38 : vector<16x16x4xf32> to vector<256x4xf32>
    %c0_24 = arith.constant 0 : index
    %c2 = arith.constant 2 : index
    %c0_25 = arith.constant 0 : index
    %c0_26 = arith.constant 0 : index
    %40 = vector.load %arg3[%c0_24, %c2, %c0_25, %c0_26] : memref<3x3x4x4xf32, #tpu.memory_space<vmem>>, vector<1x1x4x4xf32>
    %41 = vector.shape_cast %40 : vector<1x1x4x4xf32> to vector<4x4xf32>
    %cst_27 = arith.constant dense<0.000000e+00> : vector<256x4xf32>
    %42 = tpu.matmul %39, %41, %cst_27 {dimension_numbers = #tpu.dot_dimension_numbers<[1], [0], [0], [1], [0, 0, 1, 1], [], []>} : vector<256x4xf32>, vector<4x4xf32>, vector<256x4xf32> -> vector<256x4xf32>
    %43 = arith.addf %37, %42 : vector<256x4xf32>
    %44 = vector.extract_strided_slice %26 {offsets = [1, 0, 0], sizes = [16, 16, 4], strides = [1, 1, 1]} : vector<18x18x4xf32> to vector<16x16x4xf32>
    %45 = vector.shape_cast %44 : vector<16x16x4xf32> to vector<256x4xf32>
    %c1_28 = arith.constant 1 : index
    %c0_29 = arith.constant 0 : index
    %c0_30 = arith.constant 0 : index
    %c0_31 = arith.constant 0 : index
    %46 = vector.load %arg3[%c1_28, %c0_29, %c0_30, %c0_31] : memref<3x3x4x4xf32, #tpu.memory_space<vmem>>, vector<1x1x4x4xf32>
    %47 = vector.shape_cast %46 : vector<1x1x4x4xf32> to vector<4x4xf32>
    %cst_32 = arith.constant dense<0.000000e+00> : vector<256x4xf32>
    %48 = tpu.matmul %45, %47, %cst_32 {dimension_numbers = #tpu.dot_dimension_numbers<[1], [0], [0], [1], [0, 0, 1, 1], [], []>} : vector<256x4xf32>, vector<4x4xf32>, vector<256x4xf32> -> vector<256x4xf32>
    %49 = arith.addf %43, %48 : vector<256x4xf32>
    %50 = vector.extract_strided_slice %26 {offsets = [1, 1, 0], sizes = [16, 16, 4], strides = [1, 1, 1]} : vector<18x18x4xf32> to vector<16x16x4xf32>
    %51 = vector.shape_cast %50 : vector<16x16x4xf32> to vector<256x4xf32>
    %c1_33 = arith.constant 1 : index
    %c1_34 = arith.constant 1 : index
    %c0_35 = arith.constant 0 : index
    %c0_36 = arith.constant 0 : index
    %52 = vector.load %arg3[%c1_33, %c1_34, %c0_35, %c0_36] : memref<3x3x4x4xf32, #tpu.memory_space<vmem>>, vector<1x1x4x4xf32>
    %53 = vector.shape_cast %52 : vector<1x1x4x4xf32> to vector<4x4xf32>
    %cst_37 = arith.constant dense<0.000000e+00> : vector<256x4xf32>
    %54 = tpu.matmul %51, %53, %cst_37 {dimension_numbers = #tpu.dot_dimension_numbers<[1], [0], [0], [1], [0, 0, 1, 1], [], []>} : vector<256x4xf32>, vector<4x4xf32>, vector<256x4xf32> -> vector<256x4xf32>
    %55 = arith.addf %49, %54 : vector<256x4xf32>
    %56 = vector.extract_strided_slice %26 {offsets = [1, 2, 0], sizes = [16, 16, 4], strides = [1, 1, 1]} : vector<18x18x4xf32> to vector<16x16x4xf32>
    %57 = vector.shape_cast %56 : vector<16x16x4xf32> to vector<256x4xf32>
    %c1_38 = arith.constant 1 : index
    %c2_39 = arith.constant 2 : index
    %c0_40 = arith.constant 0 : index
    %c0_41 = arith.constant 0 : index
    %58 = vector.load %arg3[%c1_38, %c2_39, %c0_40, %c0_41] : memref<3x3x4x4xf32, #tpu.memory_space<vmem>>, vector<1x1x4x4xf32>
    %59 = vector.shape_cast %58 : vector<1x1x4x4xf32> to vector<4x4xf32>
    %cst_42 = arith.constant dense<0.000000e+00> : vector<256x4xf32>
    %60 = tpu.matmul %57, %59, %cst_42 {dimension_numbers = #tpu.dot_dimension_numbers<[1], [0], [0], [1], [0, 0, 1, 1], [], []>} : vector<256x4xf32>, vector<4x4xf32>, vector<256x4xf32> -> vector<256x4xf32>
    %61 = arith.addf %55, %60 : vector<256x4xf32>
    %62 = vector.extract_strided_slice %26 {offsets = [2, 0, 0], sizes = [16, 16, 4], strides = [1, 1, 1]} : vector<18x18x4xf32> to vector<16x16x4xf32>
    %63 = vector.shape_cast %62 : vector<16x16x4xf32> to vector<256x4xf32>
    %c2_43 = arith.constant 2 : index
    %c0_44 = arith.constant 0 : index
    %c0_45 = arith.constant 0 : index
    %c0_46 = arith.constant 0 : index
    %64 = vector.load %arg3[%c2_43, %c0_44, %c0_45, %c0_46] : memref<3x3x4x4xf32, #tpu.memory_space<vmem>>, vector<1x1x4x4xf32>
    %65 = vector.shape_cast %64 : vector<1x1x4x4xf32> to vector<4x4xf32>
    %cst_47 = arith.constant dense<0.000000e+00> : vector<256x4xf32>
    %66 = tpu.matmul %63, %65, %cst_47 {dimension_numbers = #tpu.dot_dimension_numbers<[1], [0], [0], [1], [0, 0, 1, 1], [], []>} : vector<256x4xf32>, vector<4x4xf32>, vector<256x4xf32> -> vector<256x4xf32>
    %67 = arith.addf %61, %66 : vector<256x4xf32>
    %68 = vector.extract_strided_slice %26 {offsets = [2, 1, 0], sizes = [16, 16, 4], strides = [1, 1, 1]} : vector<18x18x4xf32> to vector<16x16x4xf32>
    %69 = vector.shape_cast %68 : vector<16x16x4xf32> to vector<256x4xf32>
    %c2_48 = arith.constant 2 : index
    %c1_49 = arith.constant 1 : index
    %c0_50 = arith.constant 0 : index
    %c0_51 = arith.constant 0 : index
    %70 = vector.load %arg3[%c2_48, %c1_49, %c0_50, %c0_51] : memref<3x3x4x4xf32, #tpu.memory_space<vmem>>, vector<1x1x4x4xf32>
    %71 = vector.shape_cast %70 : vector<1x1x4x4xf32> to vector<4x4xf32>
    %cst_52 = arith.constant dense<0.000000e+00> : vector<256x4xf32>
    %72 = tpu.matmul %69, %71, %cst_52 {dimension_numbers = #tpu.dot_dimension_numbers<[1], [0], [0], [1], [0, 0, 1, 1], [], []>} : vector<256x4xf32>, vector<4x4xf32>, vector<256x4xf32> -> vector<256x4xf32>
    %73 = arith.addf %67, %72 : vector<256x4xf32>
    %74 = vector.extract_strided_slice %26 {offsets = [2, 2, 0], sizes = [16, 16, 4], strides = [1, 1, 1]} : vector<18x18x4xf32> to vector<16x16x4xf32>
    %75 = vector.shape_cast %74 : vector<16x16x4xf32> to vector<256x4xf32>
    %c2_53 = arith.constant 2 : index
    %c2_54 = arith.constant 2 : index
    %c0_55 = arith.constant 0 : index
    %c0_56 = arith.constant 0 : index
    %76 = vector.load %arg3[%c2_53, %c2_54, %c0_55, %c0_56] : memref<3x3x4x4xf32, #tpu.memory_space<vmem>>, vector<1x1x4x4xf32>
    %77 = vector.shape_cast %76 : vector<1x1x4x4xf32> to vector<4x4xf32>
    %cst_57 = arith.constant dense<0.000000e+00> : vector<256x4xf32>
    %78 = tpu.matmul %75, %77, %cst_57 {dimension_numbers = #tpu.dot_dimension_numbers<[1], [0], [0], [1], [0, 0, 1, 1], [], []>} : vector<256x4xf32>, vector<4x4xf32>, vector<256x4xf32> -> vector<256x4xf32>
    %79 = arith.addf %73, %78 : vector<256x4xf32>
    %c0_58 = arith.constant 0 : index
    %c0_59 = arith.constant 0 : index
    %80 = vector.load %arg4[%c0_58, %c0_59] : memref<1x4xf32, #tpu.memory_space<vmem>>, vector<1x4xf32>
    %81 = vector.broadcast %80 : vector<1x4xf32> to vector<256x4xf32>
    %82 = arith.mulf %79, %81 : vector<256x4xf32>
    %c0_60 = arith.constant 0 : index
    %c0_61 = arith.constant 0 : index
    %83 = vector.load %arg5[%c0_60, %c0_61] : memref<1x4xf32, #tpu.memory_space<vmem>>, vector<1x4xf32>
    %84 = vector.broadcast %83 : vector<1x4xf32> to vector<256x4xf32>
    %85 = arith.addf %82, %84 : vector<256x4xf32>
    %cst_62 = arith.constant 0.000000e+00 : f32
    %86 = vector.broadcast %cst_62 : f32 to vector<256x4xf32>
    %87 = arith.maximumf %85, %86 : vector<256x4xf32>
    %c0_63 = arith.constant 0 : index
    %c0_64 = arith.constant 0 : index
    %88 = vector.load %arg6[%c0_63, %c0_64] : memref<4x4xf32, #tpu.memory_space<vmem>>, vector<4x4xf32>
    %cst_65 = arith.constant dense<0.000000e+00> : vector<256x4xf32>
    %89 = tpu.matmul %87, %88, %cst_65 {dimension_numbers = #tpu.dot_dimension_numbers<[1], [0], [0], [1], [0, 0, 1, 1], [], []>} : vector<256x4xf32>, vector<4x4xf32>, vector<256x4xf32> -> vector<256x4xf32>
    %c0_66 = arith.constant 0 : index
    %c0_67 = arith.constant 0 : index
    %90 = vector.load %arg7[%c0_66, %c0_67] : memref<1x4xf32, #tpu.memory_space<vmem>>, vector<1x4xf32>
    %91 = vector.broadcast %90 : vector<1x4xf32> to vector<256x4xf32>
    %92 = arith.mulf %89, %91 : vector<256x4xf32>
    %c0_68 = arith.constant 0 : index
    %c0_69 = arith.constant 0 : index
    %93 = vector.load %arg8[%c0_68, %c0_69] : memref<1x4xf32, #tpu.memory_space<vmem>>, vector<1x4xf32>
    %94 = vector.broadcast %93 : vector<1x4xf32> to vector<256x4xf32>
    %95 = arith.addf %92, %94 : vector<256x4xf32>
    %96 = vector.shape_cast %95 : vector<256x4xf32> to vector<16x16x4xf32>
    %97 = arith.addf %4, %96 : vector<16x16x4xf32>
    %c0_70 = arith.constant 0 : index
    %c0_71 = arith.constant 0 : index
    %c0_72 = arith.constant 0 : index
    %c0_73 = arith.constant 0 : index
    %98 = vector.load %arg9[%c0_70, %c0_71, %c0_72, %c0_73] : memref<1x16x16x4xf32, #tpu.memory_space<vmem>>, vector<1x16x16x4xf32>
    %99 = vector.shape_cast %98 : vector<1x16x16x4xf32> to vector<16x16x4xf32>
    %100 = vector.shape_cast %97 : vector<16x16x4xf32> to vector<1x16x16x4xf32>
    tpu.vector_store %arg9[%c0_70, %c0_71, %c0_72, %c0_73], %100 {strides = array<i32>} : memref<1x16x16x4xf32, #tpu.memory_space<vmem>>, vector<1x16x16x4xf32>,
    return
  }
  func.func @transform_0(%arg0: i32, %arg1: i32) -> (i32, i32, i32, i32) {
    %c0_i32 = arith.constant 0 : i32
    %c0_i32_0 = arith.constant 0 : i32
    %c0_i32_1 = arith.constant 0 : i32
    %c0_i32_2 = arith.constant 0 : i32
    return %arg0, %c0_i32, %c0_i32_0, %c0_i32_1 : i32, i32, i32, i32
  }
  func.func @transform_1(%arg0: i32, %arg1: i32) -> (i32, i32, i32, i32) {
    %c0_i32 = arith.constant 0 : i32
    %c0_i32_0 = arith.constant 0 : i32
    %c0_i32_1 = arith.constant 0 : i32
    %c0_i32_2 = arith.constant 0 : i32
    %c0_i32_3 = arith.constant 0 : i32
    return %c0_i32, %c0_i32_0, %c0_i32_1, %c0_i32_2 : i32, i32, i32, i32
  }
  func.func @transform_2(%arg0: i32, %arg1: i32) -> (i32, i32) {
    %c0_i32 = arith.constant 0 : i32
    %c0_i32_0 = arith.constant 0 : i32
    %c0_i32_1 = arith.constant 0 : i32
    return %c0_i32, %c0_i32_0 : i32, i32
  }
  func.func @transform_3(%arg0: i32, %arg1: i32) -> (i32, i32) {
    %c0_i32 = arith.constant 0 : i32
    %c0_i32_0 = arith.constant 0 : i32
    %c0_i32_1 = arith.constant 0 : i32
    return %c0_i32, %c0_i32_0 : i32, i32
  }
  func.func @transform_4(%arg0: i32, %arg1: i32) -> (i32, i32) {
    %c0_i32 = arith.constant 0 : i32
    %c0_i32_0 = arith.constant 0 : i32
    %c0_i32_1 = arith.constant 0 : i32
    return %c0_i32, %c0_i32_0 : i32, i32
  }
  func.func @transform_5(%arg0: i32, %arg1: i32) -> (i32, i32) {
    %c0_i32 = arith.constant 0 : i32
    %c0_i32_0 = arith.constant 0 : i32
    %c0_i32_1 = arith.constant 0 : i32
    return %c0_i32, %c0_i32_0 : i32, i32
  }
  func.func @transform_6(%arg0: i32, %arg1: i32) -> (i32, i32) {
    %c0_i32 = arith.constant 0 : i32
    %c0_i32_0 = arith.constant 0 : i32
    %c0_i32_1 = arith.constant 0 : i32
    return %c0_i32, %c0_i32_0 : i32, i32
  }
  func.func @transform_7(%arg0: i32, %arg1: i32) -> (i32, i32, i32, i32) {
    %c0_i32 = arith.constant 0 : i32
    %c0_i32_0 = arith.constant 0 : i32
    %c0_i32_1 = arith.constant 0 : i32
    return %arg0, %arg1, %c0_i32, %c0_i32_0 : i32, i32, i32, i32
  }
}

</mosaic_0001>

<bundles_post_ra>
// kernel: tpu_custom_call.1
= control target key start
LH: loop header
LB: loop body
LE: loop exit
PB: predicated region body
PF: predicated region fallthrough
CT: control target
= control target key end

     0   :  { %s5528_s24 = smov 0   ;;  %s5530_s25 = smov 0   ;;  %s7054_s0 = inlined_call_operand.vmem [shape: f32[2,16,16,4], index: 0, kind: input, shape index: {}]   ;;  %s7055_s1 = inlined_call_operand.vmem [shape: f32[3,3,4,4], index: 1, kind: input, shape index: {}]   ;;  %s7056_s2 = inlined_call_operand.vmem [shape: f32[1,4], index: 2, kind: input, shape index: {}]   ;;  %s7057_s3 = inlined_call_operand.vmem [shape: f32[1,4], index: 3, kind: input, shape index: {}]   ;;  %s7058_s4 = inlined_call_operand.vmem [shape: f32[4,4], index: 4, kind: input, shape index: {}]   ;;  %s7059_s5 = inlined_call_operand.vmem [shape: f32[1,4], index: 5, kind: input, shape index: {}]   ;;  %s7060_s6 = inlined_call_operand.vmem [shape: f32[1,4], index: 6, kind: input, shape index: {}]   ;;  %s7061_s7 = inlined_call_operand.vmem [shape: f32[2,16,16,4], index: 7, kind: output, shape index: {}]  }
   0x1   :  { %s5532_s26 = smov 0  }
   0x2 LB: > { %s29_s27 = sadd.s32 1, %s5481_s25  ;;  %p3967_p0 = scmp.ge.s32.totalorder %s5485_s26, 1  ;;  %s5485_s26 = sphi %s5532_s26, %s17_s26   ;;  %s5481_s25 = sphi %s5530_s25, %s7240_s25   ;;  %s5477_s24 = sphi %s5528_s24, %s7239_s24  }
   0x3   : > { %p31_p1 = scmp.ge.s32.totalorder %s29_s27, 2  ;;  %p251_p2 = scmp.lt.s32.totalorder %s5485_s26, 3 }
   0x5   : > { %s7242_s27 = smov (%p31_p1, %s29_s27), 0  ;;  %p252_p3 = pnand %p3967_p0, %p251_p2 }
   0x7   : > { %255 = sbr.rel (%p252_p3) target bundleno = 787 (0x313), region = 48 }
   0xe   : > { %v3974_v0 = vld [vmem:[%s7055_s1 + $0x4] sm:$0xf]  ;;  %vm745_vm0 = vcmask 1043456   ;;  %vm437_vm1 = vcmask 1040384   ;;  %v5487_v1 = vmov 0.0   ;;  %p288_p4 = scmp.lt.s32.totalorder %s5477_s24, 1 }
   0xf   : > { %4650 = vmatprep.subr.msk.mxu1 %vm745_vm0, %v3974_v0  ;;  %v5550_v2 = vrot.slane %v5487_v1, 7  ;;  %v4109_v3 = vld [vmem:[%s7055_s1 + $0x10] sm:$0xf]  ;;  %v5560_v4 = vld [vmem:[%s7055_s1 + $0x14] sm:$0xf]  ;;  %vm597_vm2 = vcmask 1046528  }
  0x10   : > { %4651 = vmatpush3.msk.msra.mxu1 %vm745_vm0, %v3974_v0  ;;  %4850 = vmatprep.subr.msk.mxu0 %vm745_vm0, %v4109_v3  ;;  %v564_v5 = vld [vmem:[%s7055_s1] sm:$0xf]  ;;  %s7244_s24 = smov (!%p288_p4, %s5477_s24), 1  ;;  %vm680_vm3 = vcmask 31744   ;;  %v5643_v52 = vld [vmem:[%s7055_s1 + $0x18] sm:$0xf] }
  0x11   : > { %7128 = vst [vmem:[#allocation2_spill] sm:$0xff] %v5550_v2  ;;  %v5567_v6 = vsel %vm437_vm1, 0.0, %v5550_v2  ;;  %v599_v7 = vrot.slane %v5550_v2, 1  ;;  %v5572_v8 = vsel %vm437_vm1, %v5550_v2, 0.0  ;;  %4851 = vmatpush3.msk.msra.mxu0 %vm745_vm0, %v4109_v3  ;;  %4700 = vmatprep.subr.msk.mxu1 %vm745_vm0, %v564_v5  ;;  %s4318_s13 = sshll.u32 %s7244_s24, 8  ;;  %vm1266_vm4 = vcmask 1045504  }
  0x12   : > { %7129 = vst [vmem:[#allocation3_spill] sm:$0xff] %v5567_v6  ;;  %7130 = vst [vmem:[#allocation4_spill] sm:$0xff] %v5572_v8  ;;  %v598_v9 = vrot.slane %v5567_v6, 1  ;;  %v601_v10 = vrot.slane %v5572_v8, 1  ;;  %4900 = vmatprep.subr.msk.mxu0 %vm745_vm0, %v5560_v4  ;;  %s5594_s16 = scalar_lea.vmem %s7054_s0, %s4318_s13  ;;  %s6886_s22 = scalar_lea.vmem %s7061_s7, %s4318_s13 }
  0x13   : > { %v307_v13 = vld [vmem:[%s5594_s16] sm:$0xff]  ;;  %v308_v14 = vld [vmem:[%s5594_s16 + $0x8] sm:$0xff]  ;;  %v309_v15 = vld [vmem:[%s5594_s16 + $0x10] sm:$0xff] }
  0x14   : > { %v5584_v11 = vsel %vm597_vm2, %v598_v9, %v599_v7  ;;  %v5587_v12 = vsel %vm597_vm2, %v599_v7, %v601_v10  ;;  %v367_v16 = vmax.f32 %v307_v13, 0.0  ;;  %v368_v17 = vmax.f32 %v308_v14, 0.0  ;;  %v310_v18 = vld [vmem:[%s5594_s16 + $0x18] sm:$0xff]  ;;  %v311_v20 = vld [vmem:[%s5594_s16 + $0x20] sm:$0xff]  ;;  %v312_v21 = vld [vmem:[%s5594_s16 + $0x28] sm:$0xff] }
  0x15   : > { %7131 = vst [vmem:[#allocation5_spill] sm:$0xff] %v5584_v11  ;;  %7132 = vst [vmem:[#allocation6_spill] sm:$0xff] %v5587_v12  ;;  %4652 = vmatprep.mubr.msk.f32.mxu1 %vm680_vm3, %v5584_v11  ;;  %v369_v19 = vmax.f32 %v309_v15, 0.0  ;;  %v370_v22 = vmax.f32 %v310_v18, 0.0  ;;  %v371_v23 = vmax.f32 %v311_v20, 0.0  ;;  %v372_v24 = vmax.f32 %v312_v21, 0.0 }
  0x16   : > { %4653 = vmatmul.mubr.msk.f32.vlgmr.msra.gmra.mrb[0].mxu1 %vm680_vm3, %v5587_v12  ;;  %v313_v25 = vld [vmem:[%s5594_s16 + $0x30] sm:$0xff]  ;;  %v441_v26 = vrot.slane %v367_v16, 7  ;;  %v442_v27 = vrot.slane %v368_v17, 7  ;;  %v314_v29 = vld [vmem:[%s5594_s16 + $0x38] sm:$0xff]  ;;  %v315_v50 = vld [vmem:[%s5594_s16 + $0x40] sm:$0xff] }
  0x17   : > { %4701 = vmatpush3.msk.msra.mxu1 %vm745_vm0, %v564_v5  ;;  %v444_v28 = vrot.slane %v369_v19, 7  ;;  %v445_v30 = vrot.slane %v370_v22, 7  ;;  %v447_v31 = vrot.slane %v371_v23, 7  ;;  %v448_v32 = vrot.slane %v372_v24, 7  ;;  %v316_v51 = vld [vmem:[%s5594_s16 + $0x48] sm:$0xff]  ;;  %v317_v57 = vld [vmem:[%s5594_s16 + $0x50] sm:$0xff] }
  0x18   : > { %v373_v33 = vmax.f32 %v313_v25, 0.0  ;;  %v5610_v34 = vsel %vm437_vm1, %v441_v26, %v442_v27  ;;  %v5613_v35 = vsel %vm437_vm1, 0.0, %v441_v26  ;;  %v5616_v36 = vsel %vm437_vm1, %v442_v27, 0.0  ;;  %v318_v3 = vld [vmem:[%s5594_s16 + $0x58] sm:$0xff]  ;;  %v319_v10 = vld [vmem:[%s5594_s16 + $0x60] sm:$0xff]  ;;  %v320_v22 = vld [vmem:[%s5594_s16 + $0x68] sm:$0xff] }
  0x19   : > { %7133 = vst [vmem:[#allocation7_spill] sm:$0xff] %v5610_v34  ;;  %7134 = vst [vmem:[#allocation8_spill] sm:$0xff] %v5613_v35  ;;  %v5619_v37 = vsel %vm437_vm1, 0.0, %v444_v28  ;;  %v603_v38 = vrot.slane %v5613_v35, 1  ;;  %v604_v39 = vrot.slane %v5610_v34, 1  ;;  %v606_v40 = vrot.slane %v5616_v36, 1 }
  0x1a   : > { %v374_v41 = vmax.f32 %v314_v29, 0.0  ;;  %v5625_v42 = vsel %vm437_vm1, %v444_v28, %v445_v30  ;;  %v608_v43 = vrot.slane %v5619_v37, 1  ;;  %v5629_v44 = vsel %vm437_vm1, %v445_v30, 0.0  ;;  %v5688_v13 = vld [vmem:[%s7055_s1 + $0x8] sm:$0xf]  ;;  %v321_v27 = vld [vmem:[%s5594_s16 + $0x70] sm:$0xff] }
  0x1b   : > { %v5632_v45 = vsel %vm437_vm1, %v447_v31, %v448_v32  ;;  %v605_v46 = vsel %vm597_vm2, %v603_v38, %v604_v39  ;;  %v607_v47 = vsel %vm597_vm2, %v604_v39, %v606_v40  ;;  %v609_v48 = vrot.slane %v5625_v42, 1  ;;  %4750 = vmatprep.subr.msk.mxu1 %vm745_vm0, %v5688_v13  ;;  %v322_v38 = vld [vmem:[%s5594_s16 + $0x78] sm:$0xff]  ;;  %v332_v12 = vld [vmem:[%s5594_s16 + $0xc8] sm:$0xff] }
  0x1c   : > { %v611_v49 = vrot.slane %v5629_v44, 1  ;;  %4655 = vmatprep.mubr.msk.f32.mxu1 %vm680_vm3, %v605_v46  ;;  %4852 = vmatprep.mubr.msk.f32.mxu0 %vm680_vm3, %v605_v46  ;;  %v5648_v53 = vsel %vm437_vm1, 0.0, %v447_v31  ;;  %v614_v54 = vrot.slane %v5632_v45, 1  ;;  %v5652_v55 = vsel %vm437_vm1, %v448_v32, 0.0 }
  0x1d   : > { %v450_v56 = vrot.slane %v373_v33, 7  ;;  %4656 = vmatmul.mubr.msk.f32.gmra.mrb[2].mxu1 %vm680_vm3, %v607_v47  ;;  %4853 = vmatmul.mubr.msk.f32.vlgmr.msra.gmra.mrb[0].mxu0 %vm680_vm3, %v607_v47  ;;  %v5658_v58 = vsel %vm597_vm2, %v608_v43, %v609_v48  ;;  %v613_v60 = vrot.slane %v5648_v53, 1  ;;  %v616_v61 = vrot.slane %v5652_v55, 1 }
  0x1e   : > { %7135 = vst [vmem:[#allocation9_spill] sm:$0xff] %v5658_v58  ;;  %v5661_v59 = vsel %vm597_vm2, %v609_v48, %v611_v49  ;;  %4901 = vmatpush3.msk.msra.mxu0 %vm745_vm0, %v5560_v4  ;;  %4658 = vmatprep.mubr.msk.f32.mxu1 %vm680_vm3, %v5658_v58  ;;  %v451_v62 = vrot.slane %v374_v41, 7  ;;  %v375_v0 = vmax.f32 %v315_v50, 0.0  ;;  %v376_v1 = vmax.f32 %v316_v51, 0.0 }
  0x1f   : > { %7136 = vst [vmem:[#allocation10_spill] sm:$0xff] %v5661_v59  ;;  %v5670_v63 = vsel %vm437_vm1, 0.0, %v450_v56  ;;  %4855 = vmatprep.mubr.msk.f32.mxu0 %vm680_vm3, %v5658_v58  ;;  %v5676_v5 = vsel %vm597_vm2, %v613_v60, %v614_v54  ;;  %v5679_v7 = vsel %vm597_vm2, %v614_v54, %v616_v61  ;;  %v377_v9 = vmax.f32 %v317_v57, 0.0  ;;  %4950 = vmatprep.subr.msk.mxu0 %vm745_vm0, %v5643_v52  ;;  %v324_v57 = vld [vmem:[%s5594_s16 + $0x88] sm:$0xff]  ;;  %v338_v58 = vld [vmem:[%s5594_s16 + $0xf8] sm:$0xff] }
  0x20   : > { %7137 = vst [vmem:[#allocation11_spill] sm:$0xff] %v5676_v5  ;;  %7138 = vst [vmem:[#allocation12_spill] sm:$0xff] %v5679_v7  ;;  %v618_v4 = vrot.slane %v5670_v63, 1  ;;  %v5691_v14 = vsel %vm437_vm1, %v450_v56, %v451_v62  ;;  %v5694_v15 = vsel %vm437_vm1, %v451_v62, 0.0  ;;  %v453_v16 = vrot.slane %v375_v0, 7  ;;  %v323_v56 = vld [vmem:[%s5594_s16 + $0x80] sm:$0xff] }
  0x21   : > { %v454_v17 = vrot.slane %v376_v1, 7  ;;  %4659 = vmatmul.mubr.msk.f32.gmra.mrb[4].mxu1 %vm680_vm3, %v5661_v59  ;;  %4856 = vmatmul.mubr.msk.f32.gmra.mrb[2].mxu0 %vm680_vm3, %v5661_v59  ;;  %v619_v18 = vrot.slane %v5691_v14, 1  ;;  %v621_v19 = vrot.slane %v5694_v15, 1  ;;  %v378_v20 = vmax.f32 %v318_v3, 0.0  ;;  %v325_v0 = vld [vmem:[%s5594_s16 + $0x90] sm:$0xff] }
  0x22   : > { %v456_v21 = vrot.slane %v377_v9, 7  ;;  %4661 = vmatprep.mubr.msk.f32.mxu1 %vm680_vm3, %v5676_v5  ;;  %4858 = vmatprep.mubr.msk.f32.mxu0 %vm680_vm3, %v5676_v5  ;;  %v5713_v24 = vsel %vm437_vm1, 0.0, %v453_v16  ;;  %v379_v26 = vmax.f32 %v319_v10, 0.0  ;;  %v380_v33 = vmax.f32 %v320_v22, 0.0 }
  0x23   : > { %v5710_v23 = vsel %vm437_vm1, %v453_v16, %v454_v17  ;;  %v5716_v25 = vsel %vm437_vm1, %v454_v17, 0.0  ;;  %v5720_v28 = vsel %vm597_vm2, %v618_v4, %v619_v18  ;;  %v623_v29 = vrot.slane %v5713_v24, 1 }
  0x24   : > { %7139 = vst [vmem:[#allocation13_spill] sm:$0xff] %v5720_v28  ;;  %v624_v30 = vrot.slane %v5710_v23, 1  ;;  %v457_v31 = vrot.slane %v378_v20, 7  ;;  %v5725_v32 = vsel %vm437_vm1, 0.0, %v456_v21  ;;  %v626_v39 = vrot.slane %v5716_v25, 1 }
  0x25   : > { %4662 = vmatmul.mubr.msk.f32.gmra.mrb[6].mxu1 %vm680_vm3, %v5679_v7  ;;  %4859 = vmatmul.mubr.msk.f32.gmra.mrb[4].mxu0 %vm680_vm3, %v5679_v7  ;;  %v459_v40 = vrot.slane %v379_v26, 7  ;;  %v381_v41 = vmax.f32 %v321_v27, 0.0  ;;  %v5738_v43 = vsel %vm597_vm2, %v619_v18, %v621_v19  ;;  %v460_v48 = vrot.slane %v380_v33, 7  ;;  %v326_v18 = vld [vmem:[%s5594_s16 + $0x98] sm:$0xff]  ;;  %v327_v26 = vld [vmem:[%s5594_s16 + $0xa0] sm:$0xff] }
  0x26   : > { %4664 = vmatprep.mubr.msk.f32.mxu1 %vm680_vm3, %v5720_v28  ;;  %4861 = vmatprep.mubr.msk.f32.mxu0 %vm680_vm3, %v5720_v28  ;;  %7140 = vst [vmem:[#allocation14_spill] sm:$0xff] %v5738_v43  ;;  %v5741_v46 = vsel %vm437_vm1, %v456_v21, %v457_v31  ;;  %v5744_v47 = vsel %vm437_vm1, %v457_v31, 0.0  ;;  %v5747_v49 = vsel %vm597_vm2, %v623_v29, %v624_v30  ;;  %v628_v50 = vrot.slane %v5725_v32, 1 }
  0x27   : > { %7141 = vst [vmem:[#allocation15_spill] sm:$0xff] %v5747_v49  ;;  %v629_v51 = vrot.slane %v5741_v46, 1  ;;  %v382_v54 = vmax.f32 %v322_v38, 0.0  ;;  %v5754_v60 = vsel %vm437_vm1, %v459_v40, %v460_v48  ;;  %v5757_v61 = vsel %vm437_vm1, 0.0, %v459_v40  ;;  %v328_v40 = vld [vmem:[%s5594_s16 + $0xa8] sm:$0xff] }
  0x28   : > { %v462_v62 = vrot.slane %v381_v41, 7  ;;  %v5765_v1 = vsel %vm597_vm2, %v624_v30, %v626_v39  ;;  %v631_v3 = vrot.slane %v5744_v47, 1  ;;  %v5769_v4 = vsel %vm437_vm1, %v460_v48, 0.0 }
  0x29   : > { %4665 = vmatmul.mubr.msk.f32.gmra.mrb[8].mxu1 %vm680_vm3, %v5738_v43  ;;  %4862 = vmatmul.mubr.msk.f32.gmra.mrb[6].mxu0 %vm680_vm3, %v5738_v43  ;;  %7142 = vst [vmem:[#allocation16_spill] sm:$0xff] %v5765_v1  ;;  %v463_v9 = vrot.slane %v382_v54, 7  ;;  %v383_v16 = vmax.f32 %v323_v56, 0.0  ;;  %v384_v17 = vmax.f32 %v324_v57, 0.0  ;;  %v5780_v19 = vsel %vm597_vm2, %v628_v50, %v629_v51  ;;  %v329_v57 = vld [vmem:[%s5594_s16 + $0xb0] sm:$0xff] }
  0x2a   : > { %4667 = vmatprep.mubr.msk.f32.mxu1 %vm680_vm3, %v5747_v49  ;;  %4864 = vmatprep.mubr.msk.f32.mxu0 %vm680_vm3, %v5747_v49  ;;  %v5776_v10 = vsel %vm437_vm1, 0.0, %v462_v62  ;;  %7143 = vst [vmem:[#allocation17_spill] sm:$0xff] %v5780_v19  ;;  %v633_v20 = vrot.slane %v5757_v61, 1  ;;  %v634_v21 = vrot.slane %v5754_v60, 1  ;;  %v385_v22 = vmax.f32 %v325_v0, 0.0  ;;  %v337_v49 = vld [vmem:[%s5594_s16 + $0xf0] sm:$0xff] }
  0x2b   : > { %v5786_v27 = vsel %vm437_vm1, %v462_v62, %v463_v9  ;;  %v465_v29 = vrot.slane %v383_v16, 7  ;;  %v466_v30 = vrot.slane %v384_v17, 7  ;;  %v636_v31 = vrot.slane %v5769_v4, 1 }
  0x2c   : > { %v638_v33 = vrot.slane %v5776_v10, 1  ;;  %v639_v38 = vrot.slane %v5786_v27, 1  ;;  %v386_v39 = vmax.f32 %v326_v18, 0.0  ;;  %v5801_v41 = vsel %vm597_vm2, %v629_v51, %v631_v3  ;;  %v330_v18 = vld [vmem:[%s5594_s16 + $0xb8] sm:$0xff] }
  0x2d   : > { %4668 = vmatmul.mubr.msk.f32.gmra.mrb[10].mxu1 %vm680_vm3, %v5765_v1  ;;  %4865 = vmatmul.mubr.msk.f32.gmra.mrb[8].mxu0 %vm680_vm3, %v5765_v1  ;;  %7144 = vst [vmem:[#allocation18_spill] sm:$0xff] %v5801_v41  ;;  %v5804_v48 = vsel %vm437_vm1, %v463_v9, 0.0  ;;  %v468_v50 = vrot.slane %v385_v22, 7  ;;  %v387_v54 = vmax.f32 %v327_v26, 0.0  ;;  %v5807_v56 = vsel %vm597_vm2, %v633_v20, %v634_v21  ;;  %v333_v1 = vld [vmem:[%s5594_s16 + $0xd0] sm:$0xff] }
  0x2e   : > { %4670 = vmatprep.mubr.msk.f32.mxu1 %vm680_vm3, %v5780_v19  ;;  %4867 = vmatprep.mubr.msk.f32.mxu0 %vm680_vm3, %v5780_v19  ;;  %7145 = vst [vmem:[#allocation19_spill] sm:$0xff] %v5807_v56  ;;  %v5811_v62 = vsel %vm437_vm1, %v465_v29, %v466_v30  ;;  %v5814_v0 = vsel %vm437_vm1, 0.0, %v465_v29  ;;  %v469_v16 = vrot.slane %v386_v39, 7  ;;  %v388_v17 = vmax.f32 %v328_v40, 0.0  ;;  %v331_v40 = vld [vmem:[%s5594_s16 + $0xc0] sm:$0xff] }
  0x2f   : > { %v5822_v51 = vsel %vm597_vm2, %v634_v21, %v636_v31  ;;  %v5825_v3 = vsel %vm597_vm2, %v638_v33, %v639_v38  ;;  %v641_v9 = vrot.slane %v5804_v48, 1  ;;  %v5829_v20 = vsel %vm437_vm1, %v466_v30, 0.0  ;;  %v335_v19 = vld [vmem:[%s5594_s16 + $0xe0] sm:$0xff] }
  0x30   : > { %7146 = vst [vmem:[#allocation20_spill] sm:$0xff] %v5822_v51  ;;  %7147 = vst [vmem:[#allocation21_spill] sm:$0xff] %v5825_v3  ;;  %v5836_v22 = vsel %vm437_vm1, 0.0, %v468_v50  ;;  %v471_v26 = vrot.slane %v387_v54, 7  ;;  %v472_v21 = vrot.slane %v388_v17, 7  ;;  %v389_v29 = vmax.f32 %v329_v57, 0.0 }
  0x31   : > { %4671 = vmatmul.mubr.msk.f32.gmra.mrb[12].mxu1 %vm680_vm3, %v5801_v41  ;;  %4868 = vmatmul.mubr.msk.f32.gmra.mrb[10].mxu0 %vm680_vm3, %v5801_v41  ;;  %v643_v31 = vrot.slane %v5814_v0, 1  ;;  %v644_v33 = vrot.slane %v5811_v62, 1  ;;  %v5841_v39 = vsel %vm437_vm1, %v468_v50, %v469_v16  ;;  %v390_v30 = vmax.f32 %v330_v18, 0.0 }
  0x32   : > { %4673 = vmatprep.mubr.msk.f32.mxu1 %vm680_vm3, %v5807_v56  ;;  %4870 = vmatprep.mubr.msk.f32.mxu0 %vm680_vm3, %v5807_v56  ;;  %v5850_v54 = vsel %vm597_vm2, %v639_v38, %v641_v9  ;;  %v646_v57 = vrot.slane %v5829_v20, 1  ;;  %v648_v17 = vrot.slane %v5836_v22, 1  ;;  %v5855_v50 = vsel %vm437_vm1, %v469_v16, 0.0 }
  0x33   : > { %7148 = vst [vmem:[#allocation22_spill] sm:$0xff] %v5850_v54  ;;  %v649_v18 = vrot.slane %v5841_v39, 1  ;;  %v5863_v38 = vsel %vm437_vm1, %v471_v26, %v472_v21  ;;  %v5866_v9 = vsel %vm437_vm1, 0.0, %v471_v26  ;;  %v474_v11 = vrot.slane %v389_v29, 7 }
  0x34   : > { %v5869_v16 = vsel %vm597_vm2, %v643_v31, %v644_v33  ;;  %v391_v56 = vmax.f32 %v331_v40, 0.0  ;;  %v392_v41 = vmax.f32 %v332_v12, 0.0  ;;  %v5879_v26 = vsel %vm597_vm2, %v644_v33, %v646_v57  ;;  %v336_v12 = vld [vmem:[%s5594_s16 + $0xe8] sm:$0xff] }
  0x35   : > { %4674 = vmatmul.mubr.msk.f32.gmra.mrb[14].mxu1 %vm680_vm3, %v5822_v51  ;;  %4871 = vmatmul.mubr.msk.f32.gmra.mrb[12].mxu0 %vm680_vm3, %v5822_v51  ;;  %7149 = vst [vmem:[#allocation23_spill] sm:$0xff] %v5869_v16  ;;  %v475_v51 = vrot.slane %v390_v30, 7  ;;  %7150 = vst [vmem:[#allocation24_spill] sm:$0xff] %v5879_v26  ;;  %v653_v29 = vrot.slane %v5866_v9, 1  ;;  %v654_v31 = vrot.slane %v5863_v38, 1  ;;  %v334_v30 = vld [vmem:[%s5594_s16 + $0xd8] sm:$0xff]  ;;  %v5890_v40 = vsel %vm597_vm2, %v648_v17, %v649_v18 }
  0x36   : > { %4676 = vmatprep.mubr.msk.f32.mxu1 %vm680_vm3, %v5825_v3  ;;  %4873 = vmatprep.mubr.msk.f32.mxu0 %vm680_vm3, %v5825_v3  ;;  %v651_v3 = vrot.slane %v5855_v50, 1  ;;  %7151 = vst [vmem:[#allocation25_spill] sm:$0xff] %v5890_v40  ;;  %v5896_v33 = vsel %vm437_vm1, 0.0, %v474_v11  ;;  %v395_v57 = vmax.f32 %v335_v19, 0.0  ;;  %v477_v28 = vrot.slane %v391_v56, 7 }
  0x37   : > { %v5900_v43 = vsel %vm437_vm1, %v474_v11, %v475_v51  ;;  %v478_v7 = vrot.slane %v392_v41, 7  ;;  %v393_v5 = vmax.f32 %v333_v1, 0.0  ;;  %v396_v17 = vmax.f32 %v336_v12, 0.0 }
  0x38   : > { %7152 = vst [vmem:[#allocation26_spill] sm:$0xff] %v5900_v43  ;;  %v5903_v59 = vsel %vm597_vm2, %v649_v18, %v651_v3  ;;  %v5911_v19 = vsel %vm597_vm2, %v653_v29, %v654_v31  ;;  %v483_v56 = vrot.slane %v395_v57, 7  ;;  %v397_v41 = vmax.f32 %v337_v49, 0.0 }
  0x39   : > { %4677 = vmatmul.mubr.msk.f32.gmra.mrb[16].mxu1 %vm680_vm3, %v5850_v54  ;;  %4874 = vmatmul.mubr.msk.f32.gmra.mrb[14].mxu0 %vm680_vm3, %v5850_v54  ;;  %v5893_v54 = vsel %vm437_vm1, %v472_v21, 0.0  ;;  %7153 = vst [vmem:[#allocation27_spill] sm:$0xff] %v5903_v59  ;;  %7154 = vst [vmem:[#allocation28_spill] sm:$0xff] %v5911_v19  ;;  %v658_v1 = vrot.slane %v5896_v33, 1  ;;  %v659_v3 = vrot.slane %v5900_v43, 1  ;;  %v5921_v21 = vsel %vm437_vm1, %v475_v51, 0.0 }
  0x3a   : > { %4679 = vmatprep.mubr.msk.f32.mxu1 %vm680_vm3, %v5869_v16  ;;  %4876 = vmatprep.mubr.msk.f32.mxu0 %vm680_vm3, %v5869_v16  ;;  %v394_v16 = vmax.f32 %v334_v30, 0.0  ;;  %v656_v11 = vrot.slane %v5893_v54, 1  ;;  %v484_v18 = vrot.slane %v396_v17, 7  ;;  %v5924_v29 = vsel %vm437_vm1, %v477_v28, %v478_v7 }
  0x3b   : > { %7155 = vst [vmem:[#allocation29_spill] sm:$0xff] %v5924_v29  ;;  %v5927_v30 = vsel %vm437_vm1, 0.0, %v477_v28  ;;  %v480_v49 = vrot.slane %v393_v5, 7  ;;  %v398_v12 = vmax.f32 %v338_v58, 0.0  ;;  %v486_v8 = vrot.slane %v397_v41, 7 }
  0x3c   : > { %7156 = vst [vmem:[#allocation30_spill] sm:$0xff] %v5927_v30  ;;  %v481_v57 = vrot.slane %v394_v16, 7  ;;  %v5940_v51 = vsel %vm597_vm2, %v654_v31, %v656_v11  ;;  %v661_v28 = vrot.slane %v5921_v21, 1  ;;  %v663_v16 = vrot.slane %v5927_v30, 1 }
  0x3d   : > { %4680 = vmatmul.mubr.msk.f32.gmra.mrb[18].mxu1 %vm680_vm3, %v5879_v26  ;;  %4877 = vmatmul.mubr.msk.f32.gmra.mrb[16].mxu0 %vm680_vm3, %v5879_v26  ;;  %v5930_v26 = vsel %vm437_vm1, %v483_v56, %v484_v18  ;;  %7159 = vst [vmem:[#allocation33_spill] sm:$0xff] %v5940_v51  ;;  %v664_v17 = vrot.slane %v5924_v29, 1  ;;  %v487_v41 = vrot.slane %v398_v12, 7  ;;  %v5952_v31 = vsel %vm597_vm2, %v658_v1, %v659_v3 }
  0x3e   : > { %4682 = vmatprep.mubr.msk.f32.mxu1 %vm680_vm3, %v5890_v40  ;;  %4879 = vmatprep.mubr.msk.f32.mxu0 %vm680_vm3, %v5890_v40  ;;  %7157 = vst [vmem:[#allocation31_spill] sm:$0xff] %v5930_v26  ;;  %v5933_v40 = vsel %vm437_vm1, %v484_v18, 0.0  ;;  %v674_v5 = vrot.slane %v5930_v26, 1  ;;  %7160 = vst [vmem:[#allocation34_spill] sm:$0xff] %v5952_v31  ;;  %v5955_v11 = vsel %vm437_vm1, %v478_v7, 0.0 }
  0x3f   : > { %7158 = vst [vmem:[#allocation32_spill] sm:$0xff] %v5933_v40  ;;  %v676_v58 = vrot.slane %v5933_v40, 1  ;;  %v5967_v40 = vsel %vm437_vm1, %v486_v8, %v487_v41  ;;  %v5970_v12 = vsel %vm437_vm1, %v487_v41, 0.0  ;;  %v666_v41 = vrot.slane %v5955_v11, 1 }
  0x40   : > { %7162 = vst [vmem:[#allocation36_spill] sm:$0xff] %v5967_v40  ;;  %7163 = vst [vmem:[#allocation37_spill] sm:$0xff] %v5970_v12  ;;  %v1942_v7 = vrot.slane %v5967_v40, 1  ;;  %v1944_v1 = vrot.slane %v5970_v12, 1  ;;  %v5992_v12 = vsel %vm437_vm1, %v481_v57, 0.0 }
  0x41   : > { %4683 = vmatmul.mubr.msk.f32.gmra.mrb[20].mxu1 %vm680_vm3, %v5903_v59  ;;  %4880 = vmatmul.mubr.msk.f32.gmra.mrb[18].mxu0 %vm680_vm3, %v5903_v59  ;;  %v5958_v18 = vsel %vm597_vm2, %v674_v5, %v676_v58  ;;  %v5961_v59 = vsel %vm437_vm1, %v480_v49, %v481_v57  ;;  %v5986_v58 = vsel %vm597_vm2, %v663_v16, %v664_v17  ;;  %v671_v57 = vrot.slane %v5992_v12, 1 }
  0x42   : > { %4685 = vmatprep.mubr.msk.f32.mxu1 %vm680_vm3, %v5911_v19  ;;  %4882 = vmatprep.mubr.msk.f32.mxu0 %vm680_vm3, %v5911_v19  ;;  %7161 = vst [vmem:[#allocation35_spill] sm:$0xff] %v5958_v18  ;;  %v5964_v19 = vsel %vm437_vm1, 0.0, %v480_v49  ;;  %v5983_v49 = vsel %vm597_vm2, %v659_v3, %v661_v28  ;;  %7165 = vst [vmem:[#allocation39_spill] sm:$0xff] %v5986_v58  ;;  %v669_v40 = vrot.slane %v5961_v59, 1  ;;  %v6017_v16 = vsel %vm437_vm1, 0.0, %v486_v8 }
  0x43   : > { %7164 = vst [vmem:[#allocation38_spill] sm:$0xff] %v5983_v49  ;;  %v5995_v26 = vsel %vm597_vm2, %v1942_v7, %v1944_v1  ;;  %v6009_v3 = vsel %vm597_vm2, %v664_v17, %v666_v41  ;;  %v1941_v8 = vrot.slane %v6017_v16, 1  ;;  %v1273_v1 = vrot.slane %v5610_v34, 2 }
  0x44   : > { %7166 = vst [vmem:[#allocation40_spill] sm:$0xff] %v5995_v26  ;;  %7167 = vst [vmem:[#allocation41_spill] sm:$0xff] %v6009_v3  ;;  %v1275_v41 = vrot.slane %v5616_v36, 2  ;;  %v6068_v36 = vld [vmem:[%s7055_s1 + $0xc] sm:$0xf] }
  0x45   : > { %4686 = vmatmul.mubr.msk.f32.gmra.mrb[22].mxu1 %vm680_vm3, %v5940_v51  ;;  %4883 = vmatmul.mubr.msk.f32.gmra.mrb[20].mxu0 %vm680_vm3, %v5940_v51  ;;  %v668_v51 = vrot.slane %v5964_v19, 1 }
  0x46   : > { %4688 = vmatprep.mubr.msk.f32.mxu1 %vm680_vm3, %v5952_v31  ;;  %4885 = vmatprep.mubr.msk.f32.mxu0 %vm680_vm3, %v5952_v31  ;;  %v5998_v31 = vsel %vm437_vm1, 0.0, %v483_v56 }
  0x47   : > { %v6013_v56 = vsel %vm597_vm2, %v668_v51, %v669_v40  ;;  %v673_v28 = vrot.slane %v5998_v31, 1  ;;  %v6028_v51 = vsel %vm597_vm2, %v669_v40, %v671_v57  ;;  %v6043_v40 = vsel %vm597_vm2, %v1941_v8, %v1942_v7 }
  0x48   : > { %7168 = vst [vmem:[#allocation42_spill] sm:$0xff] %v6013_v56  ;;  %7169 = vst [vmem:[#allocation43_spill] sm:$0xff] %v6028_v51  ;;  %v1277_v57 = vrot.slane %v5619_v37, 2  ;;  %v6075_v8 = vsel %vm1266_vm4, %v1273_v1, %v1275_v41  ;;  %v1287_v41 = vrot.slane %v5670_v63, 2 }
  0x49   : > { %4689 = vmatmul.mubr.msk.f32.gmra.mrb[24].mxu1 %vm680_vm3, %v5983_v49  ;;  %4886 = vmatmul.mubr.msk.f32.gmra.mrb[22].mxu0 %vm680_vm3, %v5983_v49  ;;  %v6031_v17 = vsel %vm597_vm2, %v673_v28, %v674_v5  ;;  %7171 = vst [vmem:[#allocation45_spill] sm:$0xff] %v6043_v40  ;;  %v1272_v5 = vrot.slane %v5613_v35, 2  ;;  %v1278_v28 = vrot.slane %v5625_v42, 2  ;;  %v1318_v49 = vrot.slane %v5841_v39, 2 }
  0x4a   : > { %4691 = vmatprep.mubr.msk.f32.mxu1 %vm680_vm3, %v5986_v58  ;;  %4888 = vmatprep.mubr.msk.f32.mxu0 %vm680_vm3, %v5986_v58  ;;  %7170 = vst [vmem:[#allocation44_spill] sm:$0xff] %v6031_v17  ;;  %v1313_v58 = vrot.slane %v5811_v62, 2 }
  0x4b   : > { %v6057_v7 = vsel %vm1266_vm4, %v1272_v5, %v1273_v1  ;;  %v1280_v5 = vrot.slane %v5629_v44, 2 }
  0x4d   : > { %4692 = vmatmul.mubr.msk.f32.gmra.mrb[26].mxu1 %vm680_vm3, %v6009_v3  ;;  %4889 = vmatmul.mubr.msk.f32.gmra.mrb[24].mxu0 %vm680_vm3, %v6009_v3  ;;  %v6101_v44 = vsel %vm1266_vm4, %v1278_v28, %v1280_v5  ;;  %v1293_v5 = vrot.slane %v5710_v23, 2  ;;  %v1308_v3 = vrot.slane %v5786_v27, 2 }
  0x4e   : > { %4694 = vmatprep.mubr.msk.f32.mxu1 %vm680_vm3, %v6013_v56  ;;  %4891 = vmatprep.mubr.msk.f32.mxu0 %vm680_vm3, %v6013_v56  ;;  %v1303_v56 = vrot.slane %v5754_v60, 2 }
  0x51   : > { %4695 = vmatmul.mubr.msk.f32.gmra.mrb[28].mxu1 %vm680_vm3, %v6028_v51  ;;  %4892 = vmatmul.mubr.msk.f32.gmra.mrb[26].mxu0 %vm680_vm3, %v6028_v51  ;;  %v1298_v51 = vrot.slane %v5741_v46, 2 }
  0x52   : > { %4697 = vmatprep.mubr.msk.f32.mxu1 %vm680_vm3, %v6031_v17  ;;  %4894 = vmatprep.mubr.msk.f32.mxu0 %vm680_vm3, %v6031_v17  ;;  %v6088_v17 = vld [vmem:[%s7055_s1 + $0x1c] sm:$0xf] }
  0x55   : > { %4698 = vmatmul.mubr.msk.f32.gmra.mrb[30].mxu1 %vm680_vm3, %v5958_v18  ;;  %4895 = vmatmul.mubr.msk.f32.gmra.mrb[28].mxu0 %vm680_vm3, %v5958_v18  ;;  %v6083_v18 = vsel %vm1266_vm4, %v1277_v57, %v1278_v28  ;;  %v1288_v57 = vrot.slane %v5691_v14, 2  ;;  %v1292_v28 = vrot.slane %v5713_v24, 2 }
  0x56   : > { %4702 = vmatprep.mubr.msk.f32.mxu1 %vm680_vm3, %v5567_v6  ;;  %4897 = vmatprep.mubr.msk.f32.mxu0 %vm680_vm3, %v6043_v40  ;;  %v1282_v40 = vrot.slane %v5648_v53, 2 }
  0x59   : > { %4703 = vmatmul.mubr.msk.f32.vlgmr.msra.gmra.mrb[0].mxu1 %vm680_vm3, %v5550_v2  ;;  %4898 = vmatmul.mubr.msk.f32.gmra.mrb[30].mxu0 %vm680_vm3, %v5995_v26  ;;  %v1283_v26 = vrot.slane %v5632_v45, 2 }
  0x5a   : > { %4705 = vmatprep.mubr.msk.f32.mxu1 %vm680_vm3, %v5613_v35  ;;  %4902 = vmatprep.mubr.msk.f32.mxu0 %vm680_vm3, %v6057_v7  ;;  %v1328_v35 = vrot.slane %v5900_v43, 2 }
  0x5b   : > { %4751 = vmatpush3.msk.msra.mxu1 %vm745_vm0, %v5688_v13  ;;  %v1285_v13 = vrot.slane %v5652_v55, 2  ;;  %v6107_v1 = vsel %vm1266_vm4, %v1282_v40, %v1283_v26  ;;  %v1290_v55 = vrot.slane %v5694_v15, 2  ;;  %v6126_v40 = vsel %vm1266_vm4, %v1287_v41, %v1288_v57 }
  0x5c   : > { %4800 = vmatprep.subr.msk.mxu1 %vm745_vm0, %v6068_v36  ;;  %v1297_v41 = vrot.slane %v5725_v32, 2 }
  0x5d   : > { %4706 = vmatmul.mubr.msk.f32.gmra.mrb[2].mxu1 %vm680_vm3, %v5610_v34  ;;  %4903 = vmatmul.mubr.msk.f32.vlgmr.msra.gmra.mrb[0].mxu0 %vm680_vm3, %v6075_v8  ;;  %v6139_v15 = vsel %vm1266_vm4, %v1288_v57, %v1290_v55  ;;  %v1300_v57 = vrot.slane %v5744_v47, 2  ;;  %v1323_v34 = vrot.slane %v5863_v38, 2 }
  0x5e   : > { %4951 = vmatpush3.msk.msra.mxu0 %vm745_vm0, %v5643_v52  ;;  %4708 = vmatprep.mubr.msk.f32.mxu1 %vm680_vm3, %v5619_v37  ;;  %v6122_v52 = vsel %vm1266_vm4, %v1283_v26, %v1285_v13  ;;  %v1295_v26 = vrot.slane %v5716_v25, 2  ;;  %v6143_v13 = vsel %vm1266_vm4, %v1292_v28, %v1293_v5  ;;  %v6160_v55 = vsel %vm1266_vm4, %v1297_v41, %v1298_v51 }
  0x5f   : > { %4905 = vmatprep.mubr.msk.f32.mxu0 %vm680_vm3, %v6083_v18  ;;  %5000 = vmatprep.subr.msk.mxu0 %vm745_vm0, %v6088_v17  ;;  %v1302_v28 = vrot.slane %v5757_v61, 2  ;;  %v6173_v47 = vsel %vm1266_vm4, %v1298_v51, %v1300_v57  ;;  %v1307_v41 = vrot.slane %v5776_v10, 2  ;;  %v1310_v51 = vrot.slane %v5804_v48, 2 }
  0x60   : > { %v6156_v25 = vsel %vm1266_vm4, %v1293_v5, %v1295_v26  ;;  %v1305_v5 = vrot.slane %v5769_v4, 2 }
  0x61   : > { %4709 = vmatmul.mubr.msk.f32.gmra.mrb[4].mxu1 %vm680_vm3, %v5625_v42  ;;  %4906 = vmatmul.mubr.msk.f32.gmra.mrb[2].mxu0 %vm680_vm3, %v6101_v44  ;;  %v6177_v26 = vsel %vm1266_vm4, %v1302_v28, %v1303_v56  ;;  %v6194_v57 = vsel %vm1266_vm4, %v1307_v41, %v1308_v3  ;;  %v1312_v28 = vrot.slane %v5814_v0, 2  ;;  %v6207_v48 = vsel %vm1266_vm4, %v1308_v3, %v1310_v51 }
  0x62   : > { %4711 = vmatprep.mubr.msk.f32.mxu1 %vm680_vm3, %v5648_v53  ;;  %4908 = vmatprep.mubr.msk.f32.mxu0 %vm680_vm3, %v6107_v1  ;;  %v6190_v4 = vsel %vm1266_vm4, %v1303_v56, %v1305_v5  ;;  %v1315_v56 = vrot.slane %v5829_v20, 2  ;;  %v1317_v41 = vrot.slane %v5836_v22, 2  ;;  %v1320_v3 = vrot.slane %v5855_v50, 2 }
  0x63   : > { %v6211_v5 = vsel %vm1266_vm4, %v1312_v28, %v1313_v58  ;;  %v1322_v28 = vrot.slane %v5866_v9, 2 }
  0x64   : > { %v6224_v20 = vsel %vm1266_vm4, %v1313_v58, %v1315_v56  ;;  %v6228_v51 = vsel %vm1266_vm4, %v1317_v41, %v1318_v49  ;;  %v6241_v50 = vsel %vm1266_vm4, %v1318_v49, %v1320_v3  ;;  %v1325_v58 = vrot.slane %v5893_v54, 2 }
  0x65   : > { %4712 = vmatmul.mubr.msk.f32.gmra.mrb[6].mxu1 %vm680_vm3, %v5632_v45  ;;  %4909 = vmatmul.mubr.msk.f32.gmra.mrb[4].mxu0 %vm680_vm3, %v6122_v52  ;;  %7172 = vst [vmem:[#allocation46_spill] sm:$0xff] %v6228_v51  ;;  %v6245_v56 = vsel %vm1266_vm4, %v1322_v28, %v1323_v34  ;;  %v1327_v41 = vrot.slane %v5896_v33, 2  ;;  %v1330_v49 = vrot.slane %v5921_v21, 2  ;;  %v1332_v28 = vrot.slane %v5927_v30, 2 }
  0x66   : > { %4714 = vmatprep.mubr.msk.f32.mxu1 %vm680_vm3, %v5670_v63  ;;  %4911 = vmatprep.mubr.msk.f32.mxu0 %vm680_vm3, %v6126_v40  ;;  %7173 = vst [vmem:[#allocation47_spill] sm:$0xff] %v6245_v56  ;;  %v6258_v54 = vsel %vm1266_vm4, %v1323_v34, %v1325_v58  ;;  %v1335_v21 = vrot.slane %v5955_v11, 2  ;;  %v1340_v11 = vrot.slane %v5992_v12, 2 }
  0x67   : > { %v6262_v3 = vsel %vm1266_vm4, %v1327_v41, %v1328_v35  ;;  %v6275_v34 = vsel %vm1266_vm4, %v1328_v35, %v1330_v49  ;;  %v1337_v41 = vrot.slane %v5964_v19, 2 }
  0x68   : > { %7174 = vst [vmem:[#allocation48_spill] sm:$0xff] %v6262_v3  ;;  %7175 = vst [vmem:[#allocation49_spill] sm:$0xff] %v6275_v34 }
  0x69   : > { %4715 = vmatmul.mubr.msk.f32.gmra.mrb[8].mxu1 %vm680_vm3, %v5691_v14  ;;  %4912 = vmatmul.mubr.msk.f32.gmra.mrb[6].mxu0 %vm680_vm3, %v6139_v15 }
  0x6a   : > { %4717 = vmatprep.mubr.msk.f32.mxu1 %vm680_vm3, %v5713_v24  ;;  %4914 = vmatprep.mubr.msk.f32.mxu0 %vm680_vm3, %v6143_v13 }
  0x6d   : > { %4718 = vmatmul.mubr.msk.f32.gmra.mrb[10].mxu1 %vm680_vm3, %v5710_v23  ;;  %4915 = vmatmul.mubr.msk.f32.gmra.mrb[8].mxu0 %vm680_vm3, %v6156_v25 }
  0x6e   : > { %4720 = vmatprep.mubr.msk.f32.mxu1 %vm680_vm3, %v5725_v32  ;;  %4917 = vmatprep.mubr.msk.f32.mxu0 %vm680_vm3, %v6160_v55 }
  0x71   : > { %4721 = vmatmul.mubr.msk.f32.gmra.mrb[12].mxu1 %vm680_vm3, %v5741_v46  ;;  %4918 = vmatmul.mubr.msk.f32.gmra.mrb[10].mxu0 %vm680_vm3, %v6173_v47 }
  0x72   : > { %4723 = vmatprep.mubr.msk.f32.mxu1 %vm680_vm3, %v5757_v61  ;;  %4920 = vmatprep.mubr.msk.f32.mxu0 %vm680_vm3, %v6177_v26 }
  0x75   : > { %4724 = vmatmul.mubr.msk.f32.gmra.mrb[14].mxu1 %vm680_vm3, %v5754_v60  ;;  %4921 = vmatmul.mubr.msk.f32.gmra.mrb[12].mxu0 %vm680_vm3, %v6190_v4 }
  0x76   : > { %4726 = vmatprep.mubr.msk.f32.mxu1 %vm680_vm3, %v5776_v10  ;;  %4923 = vmatprep.mubr.msk.f32.mxu0 %vm680_vm3, %v6194_v57 }
  0x79   : > { %4727 = vmatmul.mubr.msk.f32.gmra.mrb[16].mxu1 %vm680_vm3, %v5786_v27  ;;  %4924 = vmatmul.mubr.msk.f32.gmra.mrb[14].mxu0 %vm680_vm3, %v6207_v48 }
  0x7a   : > { %4729 = vmatprep.mubr.msk.f32.mxu1 %vm680_vm3, %v5814_v0  ;;  %4926 = vmatprep.mubr.msk.f32.mxu0 %vm680_vm3, %v6211_v5 }
  0x7d   : > { %4730 = vmatmul.mubr.msk.f32.gmra.mrb[18].mxu1 %vm680_vm3, %v5811_v62  ;;  %4927 = vmatmul.mubr.msk.f32.gmra.mrb[16].mxu0 %vm680_vm3, %v6224_v20 }
  0x7e   : > { %4732 = vmatprep.mubr.msk.f32.mxu1 %vm680_vm3, %v5836_v22  ;;  %4929 = vmatprep.mubr.msk.f32.mxu0 %vm680_vm3, %v6228_v51  ;;  %v1333_v51 = vrot.slane %v5924_v29, 2 }
  0x80   : > { %v6279_v58 = vsel %vm1266_vm4, %v1332_v28, %v1333_v51  ;;  %v6292_v35 = vsel %vm1266_vm4, %v1333_v51, %v1335_v21  ;;  %v1342_v28 = vrot.slane %v5998_v31, 2  ;;  %v7179_v51 = vld [vmem:[#allocation32_spill] sm:$0xff] }
  0x81   : > { %4733 = vmatmul.mubr.msk.f32.gmra.mrb[20].mxu1 %vm680_vm3, %v5841_v39  ;;  %4930 = vmatmul.mubr.msk.f32.gmra.mrb[18].mxu0 %vm680_vm3, %v6241_v50  ;;  %7176 = vst [vmem:[#allocation50_spill] sm:$0xff] %v6279_v58  ;;  %7177 = vst [vmem:[#allocation51_spill] sm:$0xff] %v6292_v35  ;;  %v1345_v21 = vrot.slane %v7179_v51, 2  ;;  %v7183_v51 = vld [vmem:[#allocation37_spill] sm:$0xff] }
  0x82   : > { %4735 = vmatprep.mubr.msk.f32.mxu1 %vm680_vm3, %v5866_v9  ;;  %4932 = vmatprep.mubr.msk.f32.mxu0 %vm680_vm3, %v6245_v56  ;;  %v1338_v56 = vrot.slane %v5961_v59, 2 }
  0x84   : > { %v6296_v49 = vsel %vm1266_vm4, %v1337_v41, %v1338_v56  ;;  %v6309_v12 = vsel %vm1266_vm4, %v1338_v56, %v1340_v11  ;;  %v1267_v41 = vrot.slane %v5567_v6, 2  ;;  %v7181_v56 = vld [vmem:[#allocation4_spill] sm:$0xff] }
  0x85   : > { %4736 = vmatmul.mubr.msk.f32.gmra.mrb[22].mxu1 %vm680_vm3, %v5863_v38  ;;  %4933 = vmatmul.mubr.msk.f32.gmra.mrb[20].mxu0 %vm680_vm3, %v6258_v54  ;;  %v1270_v11 = vrot.slane %v7181_v56, 2 }
  0x86   : > { %4738 = vmatprep.mubr.msk.f32.mxu1 %vm680_vm3, %v5896_v33  ;;  %4935 = vmatprep.mubr.msk.f32.mxu0 %vm680_vm3, %v6262_v3  ;;  %v7178_v3 = vld [vmem:[#allocation31_spill] sm:$0xff] }
  0x88   : > { %v7196_v56 = vld [vmem:[#allocation51_spill] sm:$0xff] }
  0x89   : > { %4739 = vmatmul.mubr.msk.f32.gmra.mrb[24].mxu1 %vm680_vm3, %v5900_v43  ;;  %4936 = vmatmul.mubr.msk.f32.gmra.mrb[22].mxu0 %vm680_vm3, %v6275_v34  ;;  %v1343_v43 = vrot.slane %v7178_v3, 2  ;;  %v7180_v34 = vld [vmem:[#allocation36_spill] sm:$0xff] }
  0x8a   : > { %4741 = vmatprep.mubr.msk.f32.mxu1 %vm680_vm3, %v5927_v30  ;;  %4938 = vmatprep.mubr.msk.f32.mxu0 %vm680_vm3, %v6279_v58  ;;  %v2213_v30 = vrot.slane %v7180_v34, 2 }
  0x8b   : > { %v6314_v58 = vsel %vm1266_vm4, %v1342_v28, %v1343_v43  ;;  %v6329_v28 = vsel %vm1266_vm4, %v1343_v43, %v1345_v21 }
  0x8c   : > { %7182 = vst [vmem:[#allocation31_spill] sm:$0xff] %v6329_v28 }
  0x8d   : > { %4742 = vmatmul.mubr.msk.f32.gmra.mrb[26].mxu1 %vm680_vm3, %v5924_v29  ;;  %4939 = vmatmul.mubr.msk.f32.gmra.mrb[24].mxu0 %vm680_vm3, %v6292_v35  ;;  %v1268_v29 = vrot.slane %v5550_v2, 2  ;;  %v2212_v35 = vrot.slane %v6017_v16, 2  ;;  %v2215_v2 = vrot.slane %v7183_v51, 2  ;;  %v7198_v51 = vld [vmem:[#allocation8_spill] sm:$0xff] }
  0x8e   : > { %4744 = vmatprep.mubr.msk.f32.mxu1 %vm680_vm3, %v5964_v19  ;;  %4941 = vmatprep.mubr.msk.f32.mxu0 %vm680_vm3, %v6296_v49 }
  0x8f   : > { %v6333_v6 = vsel %vm1266_vm4, %v1267_v41, %v1268_v29  ;;  %v6336_v34 = vsel %vm1266_vm4, %v2212_v35, %v2213_v30  ;;  %v6347_v43 = vsel %vm1266_vm4, %v1268_v29, %v1270_v11  ;;  %v6350_v21 = vsel %vm1266_vm4, %v2213_v30, %v2215_v2  ;;  %v6365_v2 = vld [vmem:[%s7055_s1 + $0x20] sm:$0xf]  ;;  %v7189_v30 = vld [vmem:[#allocation47_spill] sm:$0xff]  ;;  %v7194_v35 = vld [vmem:[#allocation29_spill] sm:$0xff] }
  0x90   : > { %7184 = vst [vmem:[#allocation32_spill] sm:$0xff] %v6333_v6  ;;  %7185 = vst [vmem:[#allocation4_spill] sm:$0xff] %v6336_v34  ;;  %v7188_v29 = vld [vmem:[#allocation46_spill] sm:$0xff]  ;;  %v7197_v11 = vld [vmem:[#allocation36_spill] sm:$0xff] }
  0x91   : > { %4745 = vmatmul.mubr.msk.f32.gmra.mrb[28].mxu1 %vm680_vm3, %v5961_v59  ;;  %4942 = vmatmul.mubr.msk.f32.gmra.mrb[26].mxu0 %vm680_vm3, %v6309_v12  ;;  %7186 = vst [vmem:[#allocation37_spill] sm:$0xff] %v6347_v43  ;;  %7187 = vst [vmem:[#allocation52_spill] sm:$0xff] %v6350_v21  ;;  %v7195_v41 = vld [vmem:[#allocation50_spill] sm:$0xff] }
  0x92   : > { %4747 = vmatprep.mubr.msk.f32.mxu1 %vm680_vm3, %v5998_v31  ;;  %4944 = vmatprep.mubr.msk.f32.mxu0 %vm680_vm3, %v6314_v58 }
  0x95   : > { %4748 = vmatmul.mubr.msk.f32.gmra.mrb[30].mxu1 %vm680_vm3, %v7178_v3  ;;  %4945 = vmatmul.mubr.msk.f32.gmra.mrb[28].mxu0 %vm680_vm3, %v6329_v28 }
  0x96   : > { %4752 = vmatprep.mubr.msk.f32.mxu1 %vm680_vm3, %v6333_v6  ;;  %4947 = vmatprep.mubr.msk.f32.mxu0 %vm680_vm3, %v6336_v34  ;;  %v7200_v6 = vld [vmem:[#allocation7_spill] sm:$0xff]  ;;  %v7202_v34 = vld [vmem:[#allocation9_spill] sm:$0xff] }
  0x99   : > { %4753 = vmatmul.mubr.msk.f32.vlgmr.msra.gmra.mrb[0].mxu1 %vm680_vm3, %v6347_v43  ;;  %4948 = vmatmul.mubr.msk.f32.gmra.mrb[30].mxu0 %vm680_vm3, %v6350_v21  ;;  %v7199_v43 = vld [vmem:[#allocation3_spill] sm:$0xff]  ;;  %v7201_v21 = vld [vmem:[#allocation2_spill] sm:$0xff] }
  0x9a   : > { %4755 = vmatprep.mubr.msk.f32.mxu1 %vm680_vm3, %v6057_v7  ;;  %4952 = vmatprep.mubr.msk.f32.mxu0 %vm680_vm3, %v5619_v37  ;;  %v7191_v7 = vld [vmem:[#allocation48_spill] sm:$0xff] }
  0x9b   : > { %4801 = vmatpush3.msk.msra.mxu1 %vm745_vm0, %v6068_v36  ;;  %v7192_v36 = vld [vmem:[#allocation30_spill] sm:$0xff] }
  0x9d   : > { %4756 = vmatmul.mubr.msk.f32.gmra.mrb[2].mxu1 %vm680_vm3, %v6075_v8  ;;  %4953 = vmatmul.mubr.msk.f32.vlgmr.msra.gmra.mrb[0].mxu0 %vm680_vm3, %v5625_v42  ;;  %v7193_v8 = vld [vmem:[#allocation49_spill] sm:$0xff] }
  0x9e   : > { %5001 = vmatpush3.msk.msra.mxu0 %vm745_vm0, %v6088_v17  ;;  %4758 = vmatprep.mubr.msk.f32.mxu1 %vm680_vm3, %v6083_v18  ;;  %v7190_v17 = vld [vmem:[#allocation26_spill] sm:$0xff] }
  0x9f   : > { %4955 = vmatprep.mubr.msk.f32.mxu0 %vm680_vm3, %v5648_v53  ;;  %5050 = vmatprep.subr.msk.mxu0 %vm745_vm0, %v6365_v2 }
  0xa1   : > { %4759 = vmatmul.mubr.msk.f32.gmra.mrb[4].mxu1 %vm680_vm3, %v6101_v44  ;;  %4956 = vmatmul.mubr.msk.f32.gmra.mrb[2].mxu0 %vm680_vm3, %v5632_v45 }
  0xa2   : > { %4761 = vmatprep.mubr.msk.f32.mxu1 %vm680_vm3, %v6107_v1  ;;  %4958 = vmatprep.mubr.msk.f32.mxu0 %vm680_vm3, %v5670_v63 }
  0xa5   : > { %4762 = vmatmul.mubr.msk.f32.gmra.mrb[6].mxu1 %vm680_vm3, %v6122_v52  ;;  %4959 = vmatmul.mubr.msk.f32.gmra.mrb[4].mxu0 %vm680_vm3, %v5691_v14 }
  0xa6   : > { %4764 = vmatprep.mubr.msk.f32.mxu1 %vm680_vm3, %v6126_v40  ;;  %4961 = vmatprep.mubr.msk.f32.mxu0 %vm680_vm3, %v5713_v24 }
  0xa9   : > { %4765 = vmatmul.mubr.msk.f32.gmra.mrb[8].mxu1 %vm680_vm3, %v6139_v15  ;;  %4962 = vmatmul.mubr.msk.f32.gmra.mrb[6].mxu0 %vm680_vm3, %v5710_v23 }
  0xaa   : > { %4767 = vmatprep.mubr.msk.f32.mxu1 %vm680_vm3, %v6143_v13  ;;  %4964 = vmatprep.mubr.msk.f32.mxu0 %vm680_vm3, %v5725_v32 }
  0xad   : > { %4768 = vmatmul.mubr.msk.f32.gmra.mrb[10].mxu1 %vm680_vm3, %v6156_v25  ;;  %4965 = vmatmul.mubr.msk.f32.gmra.mrb[8].mxu0 %vm680_vm3, %v5741_v46 }
  0xae   : > { %4770 = vmatprep.mubr.msk.f32.mxu1 %vm680_vm3, %v6160_v55  ;;  %4967 = vmatprep.mubr.msk.f32.mxu0 %vm680_vm3, %v5757_v61 }
  0xb1   : > { %4771 = vmatmul.mubr.msk.f32.gmra.mrb[12].mxu1 %vm680_vm3, %v6173_v47  ;;  %4968 = vmatmul.mubr.msk.f32.gmra.mrb[10].mxu0 %vm680_vm3, %v5754_v60 }
  0xb2   : > { %4773 = vmatprep.mubr.msk.f32.mxu1 %vm680_vm3, %v6177_v26  ;;  %4970 = vmatprep.mubr.msk.f32.mxu0 %vm680_vm3, %v5776_v10 }
  0xb5   : > { %4774 = vmatmul.mubr.msk.f32.gmra.mrb[14].mxu1 %vm680_vm3, %v6190_v4  ;;  %4971 = vmatmul.mubr.msk.f32.gmra.mrb[12].mxu0 %vm680_vm3, %v5786_v27 }
  0xb6   : > { %4776 = vmatprep.mubr.msk.f32.mxu1 %vm680_vm3, %v6194_v57  ;;  %4973 = vmatprep.mubr.msk.f32.mxu0 %vm680_vm3, %v5814_v0 }
  0xb9   : > { %4777 = vmatmul.mubr.msk.f32.gmra.mrb[16].mxu1 %vm680_vm3, %v6207_v48  ;;  %4974 = vmatmul.mubr.msk.f32.gmra.mrb[14].mxu0 %vm680_vm3, %v5811_v62 }
  0xba   : > { %4779 = vmatprep.mubr.msk.f32.mxu1 %vm680_vm3, %v6211_v5  ;;  %4976 = vmatprep.mubr.msk.f32.mxu0 %vm680_vm3, %v5836_v22 }
  0xbd   : > { %4780 = vmatmul.mubr.msk.f32.gmra.mrb[18].mxu1 %vm680_vm3, %v6224_v20  ;;  %4977 = vmatmul.mubr.msk.f32.gmra.mrb[16].mxu0 %vm680_vm3, %v5841_v39 }
  0xbe   : > { %4782 = vmatprep.mubr.msk.f32.mxu1 %vm680_vm3, %v7188_v29  ;;  %4979 = vmatprep.mubr.msk.f32.mxu0 %vm680_vm3, %v5866_v9 }
  0xc1   : > { %4783 = vmatmul.mubr.msk.f32.gmra.mrb[20].mxu1 %vm680_vm3, %v6241_v50  ;;  %4980 = vmatmul.mubr.msk.f32.gmra.mrb[18].mxu0 %vm680_vm3, %v5863_v38 }
  0xc2   : > { %4785 = vmatprep.mubr.msk.f32.mxu1 %vm680_vm3, %v7189_v30  ;;  %4982 = vmatprep.mubr.msk.f32.mxu0 %vm680_vm3, %v5896_v33 }
  0xc5   : > { %4786 = vmatmul.mubr.msk.f32.gmra.mrb[22].mxu1 %vm680_vm3, %v6258_v54  ;;  %4983 = vmatmul.mubr.msk.f32.gmra.mrb[20].mxu0 %vm680_vm3, %v7190_v17 }
  0xc6   : > { %4788 = vmatprep.mubr.msk.f32.mxu1 %vm680_vm3, %v7191_v7  ;;  %4985 = vmatprep.mubr.msk.f32.mxu0 %vm680_vm3, %v7192_v36 }
  0xc9   : > { %4789 = vmatmul.mubr.msk.f32.gmra.mrb[24].mxu1 %vm680_vm3, %v7193_v8  ;;  %4986 = vmatmul.mubr.msk.f32.gmra.mrb[22].mxu0 %vm680_vm3, %v7194_v35 }
  0xca   : > { %4791 = vmatprep.mubr.msk.f32.mxu1 %vm680_vm3, %v7195_v41  ;;  %4988 = vmatprep.mubr.msk.f32.mxu0 %vm680_vm3, %v5964_v19 }
  0xcd   : > { %4792 = vmatmul.mubr.msk.f32.gmra.mrb[26].mxu1 %vm680_vm3, %v7196_v56  ;;  %4989 = vmatmul.mubr.msk.f32.gmra.mrb[24].mxu0 %vm680_vm3, %v5961_v59 }
  0xce   : > { %4794 = vmatprep.mubr.msk.f32.mxu1 %vm680_vm3, %v6296_v49  ;;  %4991 = vmatprep.mubr.msk.f32.mxu0 %vm680_vm3, %v5998_v31 }
  0xd1   : > { %4795 = vmatmul.mubr.msk.f32.gmra.mrb[28].mxu1 %vm680_vm3, %v6309_v12  ;;  %4992 = vmatmul.mubr.msk.f32.gmra.mrb[26].mxu0 %vm680_vm3, %v7178_v3 }
  0xd2   : > { %4797 = vmatprep.mubr.msk.f32.mxu1 %vm680_vm3, %v6314_v58  ;;  %4994 = vmatprep.mubr.msk.f32.mxu0 %vm680_vm3, %v6017_v16 }
  0xd5   : > { %4798 = vmatmul.mubr.msk.f32.gmra.mrb[30].mxu1 %vm680_vm3, %v6329_v28  ;;  %4995 = vmatmul.mubr.msk.f32.gmra.mrb[28].mxu0 %vm680_vm3, %v7197_v11  ;;  %v7203_v28 = vld [vmem:[#allocation10_spill] sm:$0xff] }
  0xd6   : > { %4802 = vmatprep.mubr.msk.f32.mxu1 %vm680_vm3, %v7198_v51  ;;  %4997 = vmatprep.mubr.msk.f32.mxu0 %vm680_vm3, %v7199_v43  ;;  %v7228_v43 = vld [vmem:[#allocation44_spill] sm:$0xff] }
  0xd9   : > { %4803 = vmatmul.mubr.msk.f32.vlgmr.msra.gmra.mrb[0].mxu1 %vm680_vm3, %v7200_v6  ;;  %4998 = vmatmul.mubr.msk.f32.gmra.mrb[30].mxu0 %vm680_vm3, %v7201_v21  ;;  %v7204_v6 = vld [vmem:[#allocation11_spill] sm:$0xff] }
  0xda   : > { %4805 = vmatprep.mubr.msk.f32.mxu1 %vm680_vm3, %v5619_v37  ;;  %5002 = vmatprep.mubr.msk.f32.mxu0 %vm680_vm3, %v7202_v34  ;;  %v7205_v37 = vld [vmem:[#allocation12_spill] sm:$0xff]  ;;  %v7207_v34 = vld [vmem:[#allocation14_spill] sm:$0xff]  ;;  %v7229_v21 = vld [vmem:[#allocation35_spill] sm:$0xff] }
  0xdd   : > { %4806 = vmatmul.mubr.msk.f32.gmra.mrb[2].mxu1 %vm680_vm3, %v5625_v42  ;;  %5003 = vmatmul.mubr.msk.f32.vlgmr.msra.gmra.mrb[0].mxu0 %vm680_vm3, %v7203_v28  ;;  %v7206_v42 = vld [vmem:[#allocation13_spill] sm:$0xff]  ;;  %v7227_v28 = vld [vmem:[#allocation43_spill] sm:$0xff] }
  0xde   : > { %5051 = vmatpush3.msk.msra.mxu0 %vm745_vm0, %v6365_v2  ;;  %4808 = vmatprep.mubr.msk.f32.mxu1 %vm680_vm3, %v5648_v53  ;;  %v7208_v53 = vld [vmem:[#allocation15_spill] sm:$0xff]  ;;  %v7233_v2 = vld [vmem:[#allocation6_spill] sm:$0xff] }
  0xdf   : > { %5005 = vmatprep.mubr.msk.f32.mxu0 %vm680_vm3, %v7204_v6 }
  0xe1   : > { %4809 = vmatmul.mubr.msk.f32.gmra.mrb[4].mxu1 %vm680_vm3, %v5632_v45  ;;  %5006 = vmatmul.mubr.msk.f32.gmra.mrb[2].mxu0 %vm680_vm3, %v7205_v37  ;;  %v7209_v45 = vld [vmem:[#allocation16_spill] sm:$0xff] }
  0xe2   : > { %4811 = vmatprep.mubr.msk.f32.mxu1 %vm680_vm3, %v5670_v63  ;;  %5008 = vmatprep.mubr.msk.f32.mxu0 %vm680_vm3, %v7206_v42  ;;  %v7210_v63 = vld [vmem:[#allocation17_spill] sm:$0xff] }
  0xe5   : > { %4812 = vmatmul.mubr.msk.f32.gmra.mrb[6].mxu1 %vm680_vm3, %v5691_v14  ;;  %5009 = vmatmul.mubr.msk.f32.gmra.mrb[4].mxu0 %vm680_vm3, %v7207_v34  ;;  %v7211_v14 = vld [vmem:[#allocation18_spill] sm:$0xff] }
  0xe6   : > { %4814 = vmatprep.mubr.msk.f32.mxu1 %vm680_vm3, %v5713_v24  ;;  %5011 = vmatprep.mubr.msk.f32.mxu0 %vm680_vm3, %v7208_v53  ;;  %v7212_v24 = vld [vmem:[#allocation19_spill] sm:$0xff] }
  0xe9   : > { %4815 = vmatmul.mubr.msk.f32.gmra.mrb[8].mxu1 %vm680_vm3, %v5710_v23  ;;  %5012 = vmatmul.mubr.msk.f32.gmra.mrb[6].mxu0 %vm680_vm3, %v7209_v45  ;;  %v7213_v23 = vld [vmem:[#allocation20_spill] sm:$0xff]  ;;  %v6741_v45 = vld [vmem:[%s7056_s2] ss:$0 sm:$0xff] }
  0xea   : > { %4817 = vmatprep.mubr.msk.f32.mxu1 %vm680_vm3, %v5725_v32  ;;  %5014 = vmatprep.mubr.msk.f32.mxu0 %vm680_vm3, %v7210_v63  ;;  %v7214_v32 = vld [vmem:[#allocation21_spill] sm:$0xff] }
  0xed   : > { %4818 = vmatmul.mubr.msk.f32.gmra.mrb[10].mxu1 %vm680_vm3, %v5741_v46  ;;  %5015 = vmatmul.mubr.msk.f32.gmra.mrb[8].mxu0 %vm680_vm3, %v7211_v14  ;;  %v7215_v46 = vld [vmem:[#allocation22_spill] sm:$0xff] }
  0xee   : > { %4820 = vmatprep.mubr.msk.f32.mxu1 %vm680_vm3, %v5757_v61  ;;  %5017 = vmatprep.mubr.msk.f32.mxu0 %vm680_vm3, %v7212_v24  ;;  %v7216_v61 = vld [vmem:[#allocation23_spill] sm:$0xff]  ;;  %v6746_v24 = vld [vmem:[%s7057_s3] ss:$0 sm:$0xff] }
  0xf1   : > { %4821 = vmatmul.mubr.msk.f32.gmra.mrb[12].mxu1 %vm680_vm3, %v5754_v60  ;;  %5018 = vmatmul.mubr.msk.f32.gmra.mrb[10].mxu0 %vm680_vm3, %v7213_v23  ;;  %v7217_v60 = vld [vmem:[#allocation24_spill] sm:$0xff] }
  0xf2   : > { %4823 = vmatprep.mubr.msk.f32.mxu1 %vm680_vm3, %v5776_v10  ;;  %5020 = vmatprep.mubr.msk.f32.mxu0 %vm680_vm3, %v7214_v32  ;;  %v7218_v10 = vld [vmem:[#allocation25_spill] sm:$0xff] }
  0xf5   : > { %4824 = vmatmul.mubr.msk.f32.gmra.mrb[14].mxu1 %vm680_vm3, %v5786_v27  ;;  %5021 = vmatmul.mubr.msk.f32.gmra.mrb[12].mxu0 %vm680_vm3, %v7215_v46  ;;  %v7219_v27 = vld [vmem:[#allocation27_spill] sm:$0xff] }
  0xf6   : > { %4826 = vmatprep.mubr.msk.f32.mxu1 %vm680_vm3, %v5814_v0  ;;  %5023 = vmatprep.mubr.msk.f32.mxu0 %vm680_vm3, %v7216_v61  ;;  %v7220_v0 = vld [vmem:[#allocation28_spill] sm:$0xff] }
  0xf9   : > { %4827 = vmatmul.mubr.msk.f32.gmra.mrb[16].mxu1 %vm680_vm3, %v5811_v62  ;;  %5024 = vmatmul.mubr.msk.f32.gmra.mrb[14].mxu0 %vm680_vm3, %v7217_v60  ;;  %v7221_v62 = vld [vmem:[#allocation33_spill] sm:$0xff] }
  0xfa   : > { %4829 = vmatprep.mubr.msk.f32.mxu1 %vm680_vm3, %v5836_v22  ;;  %5026 = vmatprep.mubr.msk.f32.mxu0 %vm680_vm3, %v7218_v10  ;;  %v7222_v22 = vld [vmem:[#allocation34_spill] sm:$0xff] }
  0xfd   : > { %4830 = vmatmul.mubr.msk.f32.gmra.mrb[18].mxu1 %vm680_vm3, %v5841_v39  ;;  %5027 = vmatmul.mubr.msk.f32.gmra.mrb[16].mxu0 %vm680_vm3, %v7219_v27  ;;  %v7223_v39 = vld [vmem:[#allocation38_spill] sm:$0xff] }
  0xfe   : > { %4832 = vmatprep.mubr.msk.f32.mxu1 %vm680_vm3, %v5866_v9  ;;  %5029 = vmatprep.mubr.msk.f32.mxu0 %vm680_vm3, %v7220_v0  ;;  %v7224_v9 = vld [vmem:[#allocation39_spill] sm:$0xff] }
 0x101   : > { %4833 = vmatmul.mubr.msk.f32.gmra.mrb[20].mxu1 %vm680_vm3, %v5863_v38  ;;  %5030 = vmatmul.mubr.msk.f32.gmra.mrb[18].mxu0 %vm680_vm3, %v7221_v62  ;;  %v7225_v38 = vld [vmem:[#allocation41_spill] sm:$0xff] }
 0x102   : > { %4835 = vmatprep.mubr.msk.f32.mxu1 %vm680_vm3, %v5896_v33  ;;  %5032 = vmatprep.mubr.msk.f32.mxu0 %vm680_vm3, %v7222_v22  ;;  %v7226_v33 = vld [vmem:[#allocation42_spill] sm:$0xff] }
 0x105   : > { %4836 = vmatmul.mubr.msk.f32.gmra.mrb[22].mxu1 %vm680_vm3, %v7190_v17  ;;  %5033 = vmatmul.mubr.msk.f32.gmra.mrb[20].mxu0 %vm680_vm3, %v7223_v39 }
 0x106   : > { %4838 = vmatprep.mubr.msk.f32.mxu1 %vm680_vm3, %v7192_v36  ;;  %5035 = vmatprep.mubr.msk.f32.mxu0 %vm680_vm3, %v7224_v9 }
 0x109   : > { %4839 = vmatmul.mubr.msk.f32.gmra.mrb[24].mxu1 %vm680_vm3, %v7194_v35  ;;  %5036 = vmatmul.mubr.msk.f32.gmra.mrb[22].mxu0 %vm680_vm3, %v7225_v38 }
 0x10a   : > { %4841 = vmatprep.mubr.msk.f32.mxu1 %vm680_vm3, %v5964_v19  ;;  %5038 = vmatprep.mubr.msk.f32.mxu0 %vm680_vm3, %v7226_v33  ;;  %v7230_v19 = vld [vmem:[#allocation45_spill] sm:$0xff] }
 0x10d   : > { %4842 = vmatmul.mubr.msk.f32.gmra.mrb[26].mxu1 %vm680_vm3, %v5961_v59  ;;  %5039 = vmatmul.mubr.msk.f32.gmra.mrb[24].mxu0 %vm680_vm3, %v7227_v28  ;;  %v7231_v59 = vld [vmem:[#allocation40_spill] sm:$0xff] }
 0x10e   : > { %4844 = vmatprep.mubr.msk.f32.mxu1 %vm680_vm3, %v5998_v31  ;;  %5041 = vmatprep.mubr.msk.f32.mxu0 %vm680_vm3, %v7228_v43  ;;  %v7232_v31 = vld [vmem:[#allocation5_spill] sm:$0xff] }
 0x111   : > { %4845 = vmatmul.mubr.msk.f32.gmra.mrb[28].mxu1 %vm680_vm3, %v7178_v3  ;;  %5042 = vmatmul.mubr.msk.f32.gmra.mrb[26].mxu0 %vm680_vm3, %v7229_v21 }
 0x112   : > { %4847 = vmatprep.mubr.msk.f32.mxu1 %vm680_vm3, %v6017_v16  ;;  %5044 = vmatprep.mubr.msk.f32.mxu0 %vm680_vm3, %v7230_v19  ;;  %v7234_v16 = vld [vmem:[#allocation31_spill] sm:$0xff] }
 0x115   : > { %4848 = vmatmul.mubr.msk.f32.gmra.mrb[30].mxu1 %vm680_vm3, %v7197_v11  ;;  %5045 = vmatmul.mubr.msk.f32.gmra.mrb[28].mxu0 %vm680_vm3, %v7231_v59 }
 0x116   : > { %5047 = vmatprep.mubr.msk.f32.mxu0 %vm680_vm3, %v7232_v31 }
 0x119   : > { %5048 = vmatmul.mubr.msk.f32.gmra.mrb[30].mxu0 %vm680_vm3, %v7233_v2 }
 0x11a   : > { %5052 = vmatprep.mubr.msk.f32.mxu0 %vm680_vm3, %v6083_v18  ;;  %v3403_v18 = vld [vmem:[%s7058_s4] sm:$0xf] }
 0x11b   : > { %5100 = vmatprep.subr.msk.mxu1 %vm745_vm0, %v3403_v18 }
 0x11c   : > { %5101 = vmatpush3.msk.msra.mxu1 %vm745_vm0, %v3403_v18 }
 0x11d   : > { %5053 = vmatmul.mubr.msk.f32.vlgmr.msra.gmra.mrb[0].mxu0 %vm680_vm3, %v6101_v44  ;;  %v7235_v44 = vld [vmem:[#allocation4_spill] sm:$0xff] }
 0x11e   : > { %5055 = vmatprep.mubr.msk.f32.mxu0 %vm680_vm3, %v6107_v1  ;;  %v7236_v1 = vld [vmem:[#allocation52_spill] sm:$0xff] }
 0x121   : > { %5056 = vmatmul.mubr.msk.f32.gmra.mrb[2].mxu0 %vm680_vm3, %v6122_v52  ;;  %v7237_v52 = vld [vmem:[#allocation32_spill] sm:$0xff] }
 0x122   : > { %5058 = vmatprep.mubr.msk.f32.mxu0 %vm680_vm3, %v6126_v40  ;;  %v7238_v40 = vld [vmem:[#allocation37_spill] sm:$0xff] }
 0x125   : > { %5059 = vmatmul.mubr.msk.f32.gmra.mrb[4].mxu0 %vm680_vm3, %v6139_v15 }
 0x126   : > { %5061 = vmatprep.mubr.msk.f32.mxu0 %vm680_vm3, %v6143_v13 }
 0x129   : > { %5062 = vmatmul.mubr.msk.f32.gmra.mrb[6].mxu0 %vm680_vm3, %v6156_v25 }
 0x12a   : > { %5064 = vmatprep.mubr.msk.f32.mxu0 %vm680_vm3, %v6160_v55 }
 0x12d   : > { %5065 = vmatmul.mubr.msk.f32.gmra.mrb[8].mxu0 %vm680_vm3, %v6173_v47 }
 0x12e   : > { %5067 = vmatprep.mubr.msk.f32.mxu0 %vm680_vm3, %v6177_v26 }
 0x131   : > { %5068 = vmatmul.mubr.msk.f32.gmra.mrb[10].mxu0 %vm680_vm3, %v6190_v4 }
 0x132   : > { %5070 = vmatprep.mubr.msk.f32.mxu0 %vm680_vm3, %v6194_v57 }
 0x135   : > { %5071 = vmatmul.mubr.msk.f32.gmra.mrb[12].mxu0 %vm680_vm3, %v6207_v48 }
 0x136   : > { %5073 = vmatprep.mubr.msk.f32.mxu0 %vm680_vm3, %v6211_v5 }
 0x139   : > { %5074 = vmatmul.mubr.msk.f32.gmra.mrb[14].mxu0 %vm680_vm3, %v6224_v20 }
 0x13a   : > { %5076 = vmatprep.mubr.msk.f32.mxu0 %vm680_vm3, %v7188_v29 }
 0x13d   : > { %5077 = vmatmul.mubr.msk.f32.gmra.mrb[16].mxu0 %vm680_vm3, %v6241_v50 }
 0x13e   : > { %5079 = vmatprep.mubr.msk.f32.mxu0 %vm680_vm3, %v7189_v30 }
 0x141   : > { %5080 = vmatmul.mubr.msk.f32.gmra.mrb[18].mxu0 %vm680_vm3, %v6258_v54 }
 0x142   : > { %5082 = vmatprep.mubr.msk.f32.mxu0 %vm680_vm3, %v7191_v7 }
 0x145   : > { %5083 = vmatmul.mubr.msk.f32.gmra.mrb[20].mxu0 %vm680_vm3, %v7193_v8 }
 0x146   : > { %5085 = vmatprep.mubr.msk.f32.mxu0 %vm680_vm3, %v7195_v41 }
 0x149   : > { %5086 = vmatmul.mubr.msk.f32.gmra.mrb[22].mxu0 %vm680_vm3, %v7196_v56 }
 0x14a   : > { %5088 = vmatprep.mubr.msk.f32.mxu0 %vm680_vm3, %v6296_v49 }
 0x14d   : > { %5089 = vmatmul.mubr.msk.f32.gmra.mrb[24].mxu0 %vm680_vm3, %v6309_v12 }
 0x14e   : > { %5091 = vmatprep.mubr.msk.f32.mxu0 %vm680_vm3, %v6314_v58 }
 0x151   : > { %5092 = vmatmul.mubr.msk.f32.gmra.mrb[26].mxu0 %vm680_vm3, %v7234_v16 }
 0x152   : > { %5094 = vmatprep.mubr.msk.f32.mxu0 %vm680_vm3, %v7235_v44 }
 0x155   : > { %5095 = vmatmul.mubr.msk.f32.gmra.mrb[28].mxu0 %vm680_vm3, %v7236_v1 }
 0x156   : > { %5097 = vmatprep.mubr.msk.f32.mxu0 %vm680_vm3, %v7237_v52 }
 0x159   : > { %5098 = vmatmul.mubr.msk.f32.gmra.mrb[30].mxu0 %vm680_vm3, %v7238_v40 }
 0x1ac   : > { %v4804_v15 = vpop.f32.mrb[0].mxu1 }
 0x1ad   : > { %v1749_v13 = vpop.f32.mrb[1].mxu1 }
 0x1b0   : > { %v4807_v25 = vpop.f32.mrb[2].mxu1 }
 0x1b1   : > { %v1759_v55 = vpop.f32.mrb[3].mxu1 }
 0x1b4   : > { %v4810_v47 = vpop.f32.mrb[4].mxu1 }
 0x1b5   : > { %v1769_v26 = vpop.f32.mrb[5].mxu1 }
 0x1b8   : > { %v4813_v4 = vpop.f32.mrb[6].mxu1 }
 0x1b9   : > { %v1779_v57 = vpop.f32.mrb[7].mxu1 }
 0x1bc   : > { %v6690_v48 = vpop.f32.mrb[8].mxu1 }
 0x1bd   : > { %v6692_v5 = vpop.f32.mrb[9].mxu1 }
 0x1c0   : > { %v6694_v20 = vpop.f32.mrb[10].mxu1 }
 0x1c1   : > { %v6696_v50 = vpop.f32.mrb[11].mxu1 }
 0x1c4   : > { %v6698_v54 = vpop.f32.mrb[12].mxu1 }
 0x1c5   : > { %v6700_v3 = vpop.f32.mrb[13].mxu1 }
 0x1c8   : > { %v6702_v58 = vpop.f32.mrb[14].mxu1 }
 0x1c9   : > { %v6704_v49 = vpop.f32.mrb[15].mxu1 }
 0x1cc   : > { %v6706_v12 = vpop.f32.mrb[16].mxu1 }
 0x1cd   : > { %v6708_v29 = vpop.f32.mrb[17].mxu1 }
 0x1d0   : > { %v6710_v30 = vpop.f32.mrb[18].mxu1 }
 0x1d1   : > { %v6712_v17 = vpop.f32.mrb[19].mxu1 }
 0x1d4   : > { %v6714_v7 = vpop.f32.mrb[20].mxu1 }
 0x1d5   : > { %v6716_v36 = vpop.f32.mrb[21].mxu1 }
 0x1d8   : > { %v6718_v8 = vpop.f32.mrb[22].mxu1 }
 0x1d9   : > { %v6720_v35 = vpop.f32.mrb[23].mxu1 }
 0x1dc   : > { %v6722_v41 = vpop.f32.mrb[24].mxu1 }
 0x1dd   : > { %v6724_v56 = vpop.f32.mrb[25].mxu1 }
 0x1e0   : > { %v6726_v11 = vpop.f32.mrb[26].mxu1 }
 0x1e1   : > { %v6728_v51 = vpop.f32.mrb[27].mxu1 }
 0x1e4   : > { %v6730_v6 = vpop.f32.mrb[28].mxu1 }
 0x1e5   : > { %v6732_v37 = vpop.f32.mrb[29].mxu1 }
 0x1e8   : > { %v6734_v42 = vpop.f32.mrb[30].mxu1 }
 0x1e9   : > { %v6736_v34 = vpop.f32.mrb[31].mxu1 }
 0x1f0   : > { %v5054_v53 = vpop.f32.mrb[0].mxu0 }
 0x1f1   : > { %v5150_v63 = vadd.f32 %v5054_v53, %v4804_v15  ;;  %v3102_v14 = vpop.f32.mrb[1].mxu0 }
 0x1f2   : > { %v5151_v23 = vadd.f32 %v3102_v14, %v1749_v13 }
 0x1f3   : > { %v3301_v32 = vmul.f32 %v5150_v63, %v6741_v45 }
 0x1f4   : > { %v3300_v46 = vmul.f32 %v5151_v23, %v6741_v45  ;;  %v5057_v61 = vpop.f32.mrb[2].mxu0 }
 0x1f5   : > { %v3340_v60 = vadd.f32 %v6746_v24, %v3301_v32  ;;  %v5152_v10 = vadd.f32 %v5057_v61, %v4807_v25  ;;  %v3112_v27 = vpop.f32.mrb[3].mxu0 }
 0x1f6   : > { %v3339_v0 = vadd.f32 %v6746_v24, %v3300_v46  ;;  %v5153_v62 = vadd.f32 %v3112_v27, %v1759_v55 }
 0x1f7   : > { %v3303_v22 = vmul.f32 %v5152_v10, %v6741_v45  ;;  %v3372_v33 = vmax.f32 %v3340_v60, 0.0 }
 0x1f8   : > { %v3371_v39 = vmax.f32 %v3339_v0, 0.0  ;;  %v3302_v9 = vmul.f32 %v5153_v62, %v6741_v45  ;;  %v5060_v38 = vpop.f32.mrb[4].mxu0 }
 0x1f9   : > { %v3342_v28 = vadd.f32 %v6746_v24, %v3303_v22  ;;  %v5154_v43 = vadd.f32 %v5060_v38, %v4810_v47  ;;  %v3122_v21 = vpop.f32.mrb[5].mxu0 }
 0x1fa   : > { %v3341_v19 = vadd.f32 %v6746_v24, %v3302_v9  ;;  %v5155_v59 = vadd.f32 %v3122_v21, %v1769_v26  ;;  %5102 = vmatprep.mubr.msk.f32.mxu1 %vm680_vm3, %v3371_v39 }
 0x1fb   : > { %v3305_v31 = vmul.f32 %v5154_v43, %v6741_v45  ;;  %5103 = vmatmul.mubr.msk.f32.vlgmr.msra.gmra.mrb[32].mxu1 %vm680_vm3, %v3372_v33  ;;  %v3374_v44 = vmax.f32 %v3342_v28, 0.0 }
 0x1fc   : > { %v3373_v2 = vmax.f32 %v3341_v19, 0.0  ;;  %v3304_v18 = vmul.f32 %v5155_v59, %v6741_v45  ;;  %v5063_v16 = vpop.f32.mrb[6].mxu0 }
 0x1fd   : > { %v3344_v1 = vadd.f32 %v6746_v24, %v3305_v31  ;;  %v5156_v52 = vadd.f32 %v5063_v16, %v4813_v4  ;;  %v3132_v40 = vpop.f32.mrb[7].mxu0 }
 0x1fe   : > { %v3343_v15 = vadd.f32 %v6746_v24, %v3304_v18  ;;  %v5157_v13 = vadd.f32 %v3132_v40, %v1779_v57  ;;  %5105 = vmatprep.mubr.msk.f32.mxu1 %vm680_vm3, %v3373_v2 }
 0x1ff   : > { %v3307_v25 = vmul.f32 %v5156_v52, %v6741_v45  ;;  %5106 = vmatmul.mubr.msk.f32.gmra.mrb[34].mxu1 %vm680_vm3, %v3374_v44  ;;  %v3376_v53 = vmax.f32 %v3344_v1, 0.0 }
 0x200   : > { %v3375_v55 = vmax.f32 %v3343_v15, 0.0  ;;  %v3306_v47 = vmul.f32 %v5157_v13, %v6741_v45  ;;  %v5066_v26 = vpop.f32.mrb[8].mxu0 }
 0x201   : > { %v3346_v63 = vadd.f32 %v6746_v24, %v3307_v25  ;;  %v5158_v14 = vadd.f32 %v5066_v26, %v6690_v48  ;;  %v3142_v4 = vpop.f32.mrb[9].mxu0 }
 0x202   : > { %v3345_v23 = vadd.f32 %v6746_v24, %v3306_v47  ;;  %v5159_v57 = vadd.f32 %v3142_v4, %v6692_v5  ;;  %5108 = vmatprep.mubr.msk.f32.mxu1 %vm680_vm3, %v3375_v55 }
 0x203   : > { %v3309_v32 = vmul.f32 %v5158_v14, %v6741_v45  ;;  %5109 = vmatmul.mubr.msk.f32.gmra.mrb[36].mxu1 %vm680_vm3, %v3376_v53  ;;  %v3378_v10 = vmax.f32 %v3346_v63, 0.0 }
 0x204   : > { %v3377_v46 = vmax.f32 %v3345_v23, 0.0  ;;  %v3308_v61 = vmul.f32 %v5159_v57, %v6741_v45  ;;  %v5069_v60 = vpop.f32.mrb[10].mxu0 }
 0x205   : > { %v3348_v27 = vadd.f32 %v6746_v24, %v3309_v32  ;;  %v5160_v48 = vadd.f32 %v5069_v60, %v6694_v20  ;;  %v3152_v0 = vpop.f32.mrb[11].mxu0 }
 0x206   : > { %v3347_v62 = vadd.f32 %v6746_v24, %v3308_v61  ;;  %v5161_v5 = vadd.f32 %v3152_v0, %v6696_v50  ;;  %5111 = vmatprep.mubr.msk.f32.mxu1 %vm680_vm3, %v3377_v46 }
 0x207   : > { %v3311_v22 = vmul.f32 %v5160_v48, %v6741_v45  ;;  %5112 = vmatmul.mubr.msk.f32.gmra.mrb[38].mxu1 %vm680_vm3, %v3378_v10  ;;  %v3380_v33 = vmax.f32 %v3348_v27, 0.0 }
 0x208   : > { %v3379_v39 = vmax.f32 %v3347_v62, 0.0  ;;  %v3310_v9 = vmul.f32 %v5161_v5, %v6741_v45  ;;  %v5072_v38 = vpop.f32.mrb[12].mxu0 }
 0x209   : > { %v3350_v28 = vadd.f32 %v6746_v24, %v3311_v22  ;;  %v5162_v20 = vadd.f32 %v5072_v38, %v6698_v54  ;;  %v3162_v43 = vpop.f32.mrb[13].mxu0 }
 0x20a   : > { %v3349_v21 = vadd.f32 %v6746_v24, %v3310_v9  ;;  %v5163_v50 = vadd.f32 %v3162_v43, %v6700_v3  ;;  %5114 = vmatprep.mubr.msk.f32.mxu1 %vm680_vm3, %v3379_v39 }
 0x20b   : > { %v3313_v19 = vmul.f32 %v5162_v20, %v6741_v45  ;;  %5115 = vmatmul.mubr.msk.f32.gmra.mrb[40].mxu1 %vm680_vm3, %v3380_v33  ;;  %v3382_v18 = vmax.f32 %v3350_v28, 0.0 }
 0x20c   : > { %v3381_v59 = vmax.f32 %v3349_v21, 0.0  ;;  %v3312_v31 = vmul.f32 %v5163_v50, %v6741_v45  ;;  %v5075_v2 = vpop.f32.mrb[14].mxu0 }
 0x20d   : > { %v3352_v16 = vadd.f32 %v6746_v24, %v3313_v19  ;;  %v5164_v54 = vadd.f32 %v5075_v2, %v6702_v58  ;;  %v3172_v44 = vpop.f32.mrb[15].mxu0 }
 0x20e   : > { %v3351_v1 = vadd.f32 %v6746_v24, %v3312_v31  ;;  %v5165_v3 = vadd.f32 %v3172_v44, %v6704_v49  ;;  %5117 = vmatprep.mubr.msk.f32.mxu1 %vm680_vm3, %v3381_v59 }
 0x20f   : > { %v3315_v52 = vmul.f32 %v5164_v54, %v6741_v45  ;;  %5118 = vmatmul.mubr.msk.f32.gmra.mrb[42].mxu1 %vm680_vm3, %v3382_v18  ;;  %v3384_v25 = vmax.f32 %v3352_v16, 0.0 }
 0x210   : > { %v3383_v40 = vmax.f32 %v3351_v1, 0.0  ;;  %v3314_v15 = vmul.f32 %v5165_v3, %v6741_v45  ;;  %v5078_v13 = vpop.f32.mrb[16].mxu0 }
 0x211   : > { %v3354_v55 = vadd.f32 %v6746_v24, %v3315_v52  ;;  %v5166_v58 = vadd.f32 %v5078_v13, %v6706_v12  ;;  %v3182_v47 = vpop.f32.mrb[17].mxu0 }
 0x212   : > { %v3353_v26 = vadd.f32 %v6746_v24, %v3314_v15  ;;  %v5167_v49 = vadd.f32 %v3182_v47, %v6708_v29  ;;  %5120 = vmatprep.mubr.msk.f32.mxu1 %vm680_vm3, %v3383_v40 }
 0x213   : > { %v3317_v53 = vmul.f32 %v5166_v58, %v6741_v45  ;;  %5121 = vmatmul.mubr.msk.f32.gmra.mrb[44].mxu1 %vm680_vm3, %v3384_v25  ;;  %v3386_v23 = vmax.f32 %v3354_v55, 0.0 }
 0x214   : > { %v3385_v63 = vmax.f32 %v3353_v26, 0.0  ;;  %v3316_v14 = vmul.f32 %v5167_v49, %v6741_v45  ;;  %v5081_v4 = vpop.f32.mrb[18].mxu0 }
 0x215   : > { %v3356_v57 = vadd.f32 %v6746_v24, %v3317_v53  ;;  %v5168_v12 = vadd.f32 %v5081_v4, %v6710_v30  ;;  %v3192_v32 = vpop.f32.mrb[19].mxu0 }
 0x216   : > { %v3355_v46 = vadd.f32 %v6746_v24, %v3316_v14  ;;  %v5169_v29 = vadd.f32 %v3192_v32, %v6712_v17  ;;  %5123 = vmatprep.mubr.msk.f32.mxu1 %vm680_vm3, %v3385_v63 }
 0x217   : > { %v3319_v61 = vmul.f32 %v5168_v12, %v6741_v45  ;;  %5124 = vmatmul.mubr.msk.f32.gmra.mrb[46].mxu1 %vm680_vm3, %v3386_v23  ;;  %v3388_v48 = vmax.f32 %v3356_v57, 0.0 }
 0x218   : > { %v3387_v60 = vmax.f32 %v3355_v46, 0.0  ;;  %v3318_v10 = vmul.f32 %v5169_v29, %v6741_v45  ;;  %v5084_v27 = vpop.f32.mrb[20].mxu0 }
 0x219   : > { %v3358_v0 = vadd.f32 %v6746_v24, %v3319_v61  ;;  %v5170_v30 = vadd.f32 %v5084_v27, %v6714_v7  ;;  %v3202_v62 = vpop.f32.mrb[21].mxu0 }
 0x21a   : > { %v3357_v5 = vadd.f32 %v6746_v24, %v3318_v10  ;;  %v5171_v17 = vadd.f32 %v3202_v62, %v6716_v36  ;;  %5126 = vmatprep.mubr.msk.f32.mxu1 %vm680_vm3, %v3387_v60 }
 0x21b   : > { %v3321_v22 = vmul.f32 %v5170_v30, %v6741_v45  ;;  %5127 = vmatmul.mubr.msk.f32.gmra.mrb[48].mxu1 %vm680_vm3, %v3388_v48  ;;  %v3390_v33 = vmax.f32 %v3358_v0, 0.0 }
 0x21c   : > { %v3389_v39 = vmax.f32 %v3357_v5, 0.0  ;;  %v3320_v9 = vmul.f32 %v5171_v17, %v6741_v45  ;;  %v5087_v38 = vpop.f32.mrb[22].mxu0 }
 0x21d   : > { %v3360_v28 = vadd.f32 %v6746_v24, %v3321_v22  ;;  %v5172_v7 = vadd.f32 %v5087_v38, %v6718_v8  ;;  %v3212_v20 = vpop.f32.mrb[23].mxu0  ;;  %v5431_v38 = vld [vmem:[%s5594_s16 + $0x8] sm:$0xff] }
 0x21e   : > { %v3359_v43 = vadd.f32 %v6746_v24, %v3320_v9  ;;  %v5173_v36 = vadd.f32 %v3212_v20, %v6720_v35  ;;  %5129 = vmatprep.mubr.msk.f32.mxu1 %vm680_vm3, %v3389_v39  ;;  %v5432_v20 = vld [vmem:[%s5594_s16] sm:$0xff] }
 0x21f   : > { %v3323_v21 = vmul.f32 %v5172_v7, %v6741_v45  ;;  %5130 = vmatmul.mubr.msk.f32.gmra.mrb[50].mxu1 %vm680_vm3, %v3390_v33  ;;  %v3392_v31 = vmax.f32 %v3360_v28, 0.0 }
 0x220   : > { %v3391_v50 = vmax.f32 %v3359_v43, 0.0  ;;  %v3322_v19 = vmul.f32 %v5173_v36, %v6741_v45  ;;  %v5090_v59 = vpop.f32.mrb[24].mxu0 }
 0x221   : > { %v3362_v2 = vadd.f32 %v6746_v24, %v3323_v21  ;;  %v5174_v8 = vadd.f32 %v5090_v59, %v6722_v41  ;;  %v3222_v18 = vpop.f32.mrb[25].mxu0  ;;  %v5433_v59 = vld [vmem:[%s5594_s16 + $0x18] sm:$0xff] }
 0x222   : > { %v3361_v16 = vadd.f32 %v6746_v24, %v3322_v19  ;;  %v5175_v35 = vadd.f32 %v3222_v18, %v6724_v56  ;;  %5132 = vmatprep.mubr.msk.f32.mxu1 %vm680_vm3, %v3391_v50  ;;  %v5434_v18 = vld [vmem:[%s5594_s16 + $0x10] sm:$0xff] }
 0x223   : > { %v3325_v54 = vmul.f32 %v5174_v8, %v6741_v45  ;;  %5133 = vmatmul.mubr.msk.f32.gmra.mrb[52].mxu1 %vm680_vm3, %v3392_v31  ;;  %v3394_v52 = vmax.f32 %v3362_v2, 0.0 }
 0x224   : > { %v3393_v44 = vmax.f32 %v3361_v16, 0.0  ;;  %v3324_v1 = vmul.f32 %v5175_v35, %v6741_v45  ;;  %v5093_v3 = vpop.f32.mrb[26].mxu0 }
 0x225   : > { %v3364_v40 = vadd.f32 %v6746_v24, %v3325_v54  ;;  %v5176_v41 = vadd.f32 %v5093_v3, %v6726_v11  ;;  %v3232_v15 = vpop.f32.mrb[27].mxu0  ;;  %v5435_v3 = vld [vmem:[%s5594_s16 + $0x28] sm:$0xff] }
 0x226   : > { %v3363_v13 = vadd.f32 %v6746_v24, %v3324_v1  ;;  %v5177_v56 = vadd.f32 %v3232_v15, %v6728_v51  ;;  %5135 = vmatprep.mubr.msk.f32.mxu1 %vm680_vm3, %v3393_v44  ;;  %v5436_v15 = vld [vmem:[%s5594_s16 + $0x20] sm:$0xff] }
 0x227   : > { %v3327_v25 = vmul.f32 %v5176_v41, %v6741_v45  ;;  %5136 = vmatmul.mubr.msk.f32.gmra.mrb[54].mxu1 %vm680_vm3, %v3394_v52  ;;  %v3396_v26 = vmax.f32 %v3364_v40, 0.0 }
 0x228   : > { %v3395_v55 = vmax.f32 %v3363_v13, 0.0  ;;  %v3326_v58 = vmul.f32 %v5177_v56, %v6741_v45  ;;  %v5096_v47 = vpop.f32.mrb[28].mxu0 }
 0x229   : > { %v3366_v49 = vadd.f32 %v6746_v24, %v3327_v25  ;;  %v5178_v11 = vadd.f32 %v5096_v47, %v6730_v6  ;;  %v3242_v53 = vpop.f32.mrb[29].mxu0  ;;  %v5437_v47 = vld [vmem:[%s5594_s16 + $0x38] sm:$0xff] }
 0x22a   : > { %v3365_v63 = vadd.f32 %v6746_v24, %v3326_v58  ;;  %v5179_v51 = vadd.f32 %v3242_v53, %v6732_v37  ;;  %5138 = vmatprep.mubr.msk.f32.mxu1 %vm680_vm3, %v3395_v55  ;;  %v5438_v53 = vld [vmem:[%s5594_s16 + $0x30] sm:$0xff] }
 0x22b   : > { %v3329_v14 = vmul.f32 %v5178_v11, %v6741_v45  ;;  %5139 = vmatmul.mubr.msk.f32.gmra.mrb[56].mxu1 %vm680_vm3, %v3396_v26  ;;  %v3398_v12 = vmax.f32 %v3366_v49, 0.0 }
 0x22c   : > { %v3397_v4 = vmax.f32 %v3365_v63, 0.0  ;;  %v3328_v23 = vmul.f32 %v5179_v51, %v6741_v45  ;;  %v5099_v57 = vpop.f32.mrb[30].mxu0 }
 0x22d   : > { %v3368_v32 = vadd.f32 %v6746_v24, %v3329_v14  ;;  %v5180_v6 = vadd.f32 %v5099_v57, %v6734_v42  ;;  %v3252_v46 = vpop.f32.mrb[31].mxu0  ;;  %v5439_v57 = vld [vmem:[%s5594_s16 + $0x48] sm:$0xff] }
 0x22e   : > { %v3367_v29 = vadd.f32 %v6746_v24, %v3328_v23  ;;  %v5181_v37 = vadd.f32 %v3252_v46, %v6736_v34  ;;  %5141 = vmatprep.mubr.msk.f32.mxu1 %vm680_vm3, %v3397_v4  ;;  %v5440_v46 = vld [vmem:[%s5594_s16 + $0x40] sm:$0xff] }
 0x22f   : > { %v3331_v61 = vmul.f32 %v5180_v6, %v6741_v45  ;;  %5142 = vmatmul.mubr.msk.f32.gmra.mrb[58].mxu1 %vm680_vm3, %v3398_v12  ;;  %v3400_v27 = vmax.f32 %v3368_v32, 0.0 }
 0x230   : > { %v3399_v60 = vmax.f32 %v3367_v29, 0.0  ;;  %v3330_v10 = vmul.f32 %v5181_v37, %v6741_v45  ;;  %v6871_v45 = vld [vmem:[%s7059_s5] ss:$0 sm:$0xff] }
 0x231   : > { %v3370_v48 = vadd.f32 %v6746_v24, %v3331_v61 }
 0x232   : > { %v3369_v42 = vadd.f32 %v6746_v24, %v3330_v10  ;;  %5144 = vmatprep.mubr.msk.f32.mxu1 %vm680_vm3, %v3399_v60  ;;  %v6876_v24 = vld [vmem:[%s7060_s6] ss:$0 sm:$0xff] }
 0x233   : > { %5145 = vmatmul.mubr.msk.f32.gmra.mrb[60].mxu1 %vm680_vm3, %v3400_v27  ;;  %v3402_v0 = vmax.f32 %v3370_v48, 0.0  ;;  %v5441_v27 = vld [vmem:[%s5594_s16 + $0x58] sm:$0xff] }
 0x234   : > { %v3401_v34 = vmax.f32 %v3369_v42, 0.0 }
 0x236   : > { %5147 = vmatprep.mubr.msk.f32.mxu1 %vm680_vm3, %v3401_v34 }
 0x237   : > { %5148 = vmatmul.mubr.msk.f32.gmra.mrb[62].mxu1 %vm680_vm3, %v3402_v0  ;;  %v5442_v0 = vld [vmem:[%s5594_s16 + $0x50] sm:$0xff] }
 0x2ce   : > { %v5104_v30 = vpop.f32.mrb[32].mxu1 }
 0x2cf   : > { %v3736_v62 = vmul.f32 %v5104_v30, %v6871_v45  ;;  %v3569_v5 = vpop.f32.mrb[33].mxu1 }
 0x2d0   : > { %v3735_v17 = vmul.f32 %v6871_v45, %v3569_v5 }
 0x2d1   : > { %v3775_v22 = vadd.f32 %v6876_v24, %v3736_v62 }
 0x2d2   : > { %v3774_v39 = vadd.f32 %v6876_v24, %v3735_v17  ;;  %v5107_v9 = vpop.f32.mrb[34].mxu1 }
 0x2d3   : > { %v3807_v33 = vadd.f32 %v5431_v38, %v3775_v22  ;;  %v3738_v28 = vmul.f32 %v5107_v9, %v6871_v45  ;;  %v3579_v7 = vpop.f32.mrb[35].mxu1 }
 0x2d4   : > { %v3806_v43 = vadd.f32 %v5432_v20, %v3774_v39  ;;  %v3737_v36 = vmul.f32 %v6871_v45, %v3579_v7  ;;  %v5443_v39 = vld [vmem:[%s5594_s16 + $0x68] sm:$0xff] }
 0x2d5   : > { %3839 = vst.msk [vmem:[%s6886_s22 + $0x8] sm:$0xff] %vm680_vm3, %v3807_v33  ;;  %v3777_v21 = vadd.f32 %v6876_v24, %v3738_v28  ;;  %v5444_v28 = vld [vmem:[%s5594_s16 + $0x60] sm:$0xff] }
 0x2d6   : > { %3838 = vst.msk [vmem:[%s6886_s22] sm:$0xff] %vm680_vm3, %v3806_v43  ;;  %v3776_v50 = vadd.f32 %v6876_v24, %v3737_v36  ;;  %v5110_v19 = vpop.f32.mrb[36].mxu1 }
 0x2d7   : > { %v3809_v31 = vadd.f32 %v5433_v59, %v3777_v21  ;;  %v3740_v2 = vmul.f32 %v5110_v19, %v6871_v45  ;;  %v3589_v8 = vpop.f32.mrb[37].mxu1 }
 0x2d8   : > { %v3808_v16 = vadd.f32 %v5434_v18, %v3776_v50  ;;  %v3739_v35 = vmul.f32 %v6871_v45, %v3589_v8  ;;  %v5445_v50 = vld [vmem:[%s5594_s16 + $0x78] sm:$0xff] }
 0x2d9   : > { %3841 = vst.msk [vmem:[%s6886_s22 + $0x18] sm:$0xff] %vm680_vm3, %v3809_v31  ;;  %v3779_v54 = vadd.f32 %v6876_v24, %v3740_v2  ;;  %v5446_v2 = vld [vmem:[%s5594_s16 + $0x70] sm:$0xff] }
 0x2da   : > { %3840 = vst.msk [vmem:[%s6886_s22 + $0x10] sm:$0xff] %vm680_vm3, %v3808_v16  ;;  %v3778_v44 = vadd.f32 %v6876_v24, %v3739_v35  ;;  %v5113_v1 = vpop.f32.mrb[38].mxu1 }
 0x2db   : > { %v3811_v52 = vadd.f32 %v5435_v3, %v3779_v54  ;;  %v3742_v40 = vmul.f32 %v5113_v1, %v6871_v45  ;;  %v3599_v41 = vpop.f32.mrb[39].mxu1 }
 0x2dc   : > { %v3810_v13 = vadd.f32 %v5436_v15, %v3778_v44  ;;  %v3741_v56 = vmul.f32 %v6871_v45, %v3599_v41  ;;  %v5447_v44 = vld [vmem:[%s5594_s16 + $0x88] sm:$0xff] }
 0x2dd   : > { %3843 = vst.msk [vmem:[%s6886_s22 + $0x28] sm:$0xff] %vm680_vm3, %v3811_v52  ;;  %v3781_v25 = vadd.f32 %v6876_v24, %v3742_v40  ;;  %v5448_v40 = vld [vmem:[%s5594_s16 + $0x80] sm:$0xff] }
 0x2de   : > { %3842 = vst.msk [vmem:[%s6886_s22 + $0x20] sm:$0xff] %vm680_vm3, %v3810_v13  ;;  %v3780_v55 = vadd.f32 %v6876_v24, %v3741_v56  ;;  %v5116_v58 = vpop.f32.mrb[40].mxu1 }
 0x2df   : > { %v3813_v26 = vadd.f32 %v5437_v47, %v3781_v25  ;;  %v3744_v49 = vmul.f32 %v5116_v58, %v6871_v45  ;;  %v3609_v11 = vpop.f32.mrb[41].mxu1 }
 0x2e0   : > { %v3812_v63 = vadd.f32 %v5438_v53, %v3780_v55  ;;  %v3743_v51 = vmul.f32 %v6871_v45, %v3609_v11  ;;  %v5449_v55 = vld [vmem:[%s5594_s16 + $0x98] sm:$0xff] }
 0x2e1   : > { %3845 = vst.msk [vmem:[%s6886_s22 + $0x38] sm:$0xff] %vm680_vm3, %v3813_v26  ;;  %v3783_v14 = vadd.f32 %v6876_v24, %v3744_v49  ;;  %v5450_v49 = vld [vmem:[%s5594_s16 + $0x90] sm:$0xff] }
 0x2e2   : > { %3844 = vst.msk [vmem:[%s6886_s22 + $0x30] sm:$0xff] %vm680_vm3, %v3812_v63  ;;  %v3782_v4 = vadd.f32 %v6876_v24, %v3743_v51  ;;  %v5119_v23 = vpop.f32.mrb[42].mxu1 }
 0x2e3   : > { %v3815_v12 = vadd.f32 %v5439_v57, %v3783_v14  ;;  %v3746_v32 = vmul.f32 %v5119_v23, %v6871_v45  ;;  %v3619_v6 = vpop.f32.mrb[43].mxu1 }
 0x2e4   : > { %v3814_v29 = vadd.f32 %v5440_v46, %v3782_v4  ;;  %v3745_v37 = vmul.f32 %v6871_v45, %v3619_v6  ;;  %v5451_v4 = vld [vmem:[%s5594_s16 + $0xa8] sm:$0xff] }
 0x2e5   : > { %3847 = vst.msk [vmem:[%s6886_s22 + $0x48] sm:$0xff] %vm680_vm3, %v3815_v12  ;;  %v3785_v61 = vadd.f32 %v6876_v24, %v3746_v32  ;;  %v5452_v32 = vld [vmem:[%s5594_s16 + $0xa0] sm:$0xff] }
 0x2e6   : > { %3846 = vst.msk [vmem:[%s6886_s22 + $0x40] sm:$0xff] %vm680_vm3, %v3814_v29  ;;  %v3784_v60 = vadd.f32 %v6876_v24, %v3745_v37  ;;  %v5122_v10 = vpop.f32.mrb[44].mxu1 }
 0x2e7   : > { %v3817_v48 = vadd.f32 %v5441_v27, %v3785_v61  ;;  %v3748_v42 = vmul.f32 %v5122_v10, %v6871_v45  ;;  %v3629_v34 = vpop.f32.mrb[45].mxu1 }
 0x2e8   : > { %v3816_v30 = vadd.f32 %v5442_v0, %v3784_v60  ;;  %v3747_v62 = vmul.f32 %v6871_v45, %v3629_v34  ;;  %v5453_v60 = vld [vmem:[%s5594_s16 + $0xb8] sm:$0xff] }
 0x2e9   : > { %3849 = vst.msk [vmem:[%s6886_s22 + $0x58] sm:$0xff] %vm680_vm3, %v3817_v48  ;;  %v3787_v5 = vadd.f32 %v6876_v24, %v3748_v42  ;;  %v5454_v42 = vld [vmem:[%s5594_s16 + $0xb0] sm:$0xff] }
 0x2ea   : > { %3848 = vst.msk [vmem:[%s6886_s22 + $0x50] sm:$0xff] %vm680_vm3, %v3816_v30  ;;  %v3786_v17 = vadd.f32 %v6876_v24, %v3747_v62  ;;  %v5125_v22 = vpop.f32.mrb[46].mxu1 }
 0x2eb   : > { %v3819_v9 = vadd.f32 %v5443_v39, %v3787_v5  ;;  %v3750_v38 = vmul.f32 %v5125_v22, %v6871_v45  ;;  %v3639_v33 = vpop.f32.mrb[47].mxu1 }
 0x2ec   : > { %v3818_v7 = vadd.f32 %v5444_v28, %v3786_v17  ;;  %v3749_v20 = vmul.f32 %v6871_v45, %v3639_v33  ;;  %v5455_v17 = vld [vmem:[%s5594_s16 + $0xc8] sm:$0xff] }
 0x2ed   : > { %3851 = vst.msk [vmem:[%s6886_s22 + $0x68] sm:$0xff] %vm680_vm3, %v3819_v9  ;;  %v3789_v43 = vadd.f32 %v6876_v24, %v3750_v38  ;;  %v5456_v38 = vld [vmem:[%s5594_s16 + $0xc0] sm:$0xff] }
 0x2ee   : > { %3850 = vst.msk [vmem:[%s6886_s22 + $0x60] sm:$0xff] %vm680_vm3, %v3818_v7  ;;  %v3788_v36 = vadd.f32 %v6876_v24, %v3749_v20  ;;  %v5128_v21 = vpop.f32.mrb[48].mxu1 }
 0x2ef   : > { %v3821_v19 = vadd.f32 %v5445_v50, %v3789_v43  ;;  %v3752_v59 = vmul.f32 %v5128_v21, %v6871_v45  ;;  %v3649_v31 = vpop.f32.mrb[49].mxu1 }
 0x2f0   : > { %v3820_v8 = vadd.f32 %v5446_v2, %v3788_v36  ;;  %v3751_v18 = vmul.f32 %v6871_v45, %v3649_v31  ;;  %v5457_v36 = vld [vmem:[%s5594_s16 + $0xd8] sm:$0xff] }
 0x2f1   : > { %3853 = vst.msk [vmem:[%s6886_s22 + $0x78] sm:$0xff] %vm680_vm3, %v3821_v19  ;;  %v3791_v16 = vadd.f32 %v6876_v24, %v3752_v59  ;;  %v5458_v59 = vld [vmem:[%s5594_s16 + $0xd0] sm:$0xff] }
 0x2f2   : > { %3852 = vst.msk [vmem:[%s6886_s22 + $0x70] sm:$0xff] %vm680_vm3, %v3820_v8  ;;  %v3790_v35 = vadd.f32 %v6876_v24, %v3751_v18  ;;  %v5131_v54 = vpop.f32.mrb[50].mxu1 }
 0x2f3   : > { %v3823_v1 = vadd.f32 %v5447_v44, %v3791_v16  ;;  %v3754_v3 = vmul.f32 %v5131_v54, %v6871_v45  ;;  %v3659_v52 = vpop.f32.mrb[51].mxu1 }
 0x2f4   : > { %v3822_v41 = vadd.f32 %v5448_v40, %v3790_v35  ;;  %v3753_v15 = vmul.f32 %v6871_v45, %v3659_v52  ;;  %v5459_v35 = vld [vmem:[%s5594_s16 + $0xe8] sm:$0xff] }
 0x2f5   : > { %3855 = vst.msk [vmem:[%s6886_s22 + $0x88] sm:$0xff] %vm680_vm3, %v3823_v1  ;;  %v3793_v13 = vadd.f32 %v6876_v24, %v3754_v3  ;;  %v5460_v3 = vld [vmem:[%s5594_s16 + $0xe0] sm:$0xff] }
 0x2f6   : > { %3854 = vst.msk [vmem:[%s6886_s22 + $0x80] sm:$0xff] %vm680_vm3, %v3822_v41  ;;  %v3792_v56 = vadd.f32 %v6876_v24, %v3753_v15  ;;  %v5134_v25 = vpop.f32.mrb[52].mxu1 }
 0x2f7   : > { %v3825_v58 = vadd.f32 %v5449_v55, %v3793_v13  ;;  %v3756_v47 = vmul.f32 %v5134_v25, %v6871_v45  ;;  %v3669_v26 = vpop.f32.mrb[53].mxu1  ;;  %v5461_v13 = vld [vmem:[%s5594_s16 + $0xf8] sm:$0xff]  ;;  %v5462_v25 = vld [vmem:[%s5594_s16 + $0xf0] sm:$0xff] }
 0x2f8   : > { %v3824_v11 = vadd.f32 %v5450_v49, %v3792_v56  ;;  %v3755_v53 = vmul.f32 %v6871_v45, %v3669_v26 }
 0x2f9   : > { %3857 = vst.msk [vmem:[%s6886_s22 + $0x98] sm:$0xff] %vm680_vm3, %v3825_v58  ;;  %v3795_v63 = vadd.f32 %v6876_v24, %v3756_v47 }
 0x2fa   : > { %3856 = vst.msk [vmem:[%s6886_s22 + $0x90] sm:$0xff] %vm680_vm3, %v3824_v11  ;;  %v3794_v51 = vadd.f32 %v6876_v24, %v3755_v53  ;;  %v5137_v14 = vpop.f32.mrb[54].mxu1 }
 0x2fb   : > { %v3827_v23 = vadd.f32 %v5451_v4, %v3795_v63  ;;  %v3758_v57 = vmul.f32 %v5137_v14, %v6871_v45  ;;  %v3679_v12 = vpop.f32.mrb[55].mxu1 }
 0x2fc   : > { %v3826_v6 = vadd.f32 %v5452_v32, %v3794_v51  ;;  %v3757_v46 = vmul.f32 %v6871_v45, %v3679_v12 }
 0x2fd   : > { %3859 = vst.msk [vmem:[%s6886_s22 + $0xa8] sm:$0xff] %vm680_vm3, %v3827_v23  ;;  %v3797_v29 = vadd.f32 %v6876_v24, %v3758_v57 }
 0x2fe   : > { %3858 = vst.msk [vmem:[%s6886_s22 + $0xa0] sm:$0xff] %vm680_vm3, %v3826_v6  ;;  %v3796_v37 = vadd.f32 %v6876_v24, %v3757_v46  ;;  %v5140_v61 = vpop.f32.mrb[56].mxu1 }
 0x2ff   : > { %v3829_v10 = vadd.f32 %v5453_v60, %v3797_v29  ;;  %v3760_v27 = vmul.f32 %v5140_v61, %v6871_v45  ;;  %v3689_v48 = vpop.f32.mrb[57].mxu1 }
 0x300   : > { %v3828_v34 = vadd.f32 %v5454_v42, %v3796_v37  ;;  %v3759_v0 = vmul.f32 %v6871_v45, %v3689_v48 }
 0x301   : > { %3861 = vst.msk [vmem:[%s6886_s22 + $0xb8] sm:$0xff] %vm680_vm3, %v3829_v10  ;;  %v3799_v30 = vadd.f32 %v6876_v24, %v3760_v27 }
 0x302   : > { %3860 = vst.msk [vmem:[%s6886_s22 + $0xb0] sm:$0xff] %vm680_vm3, %v3828_v34  ;;  %v3798_v62 = vadd.f32 %v6876_v24, %v3759_v0  ;;  %v5143_v5 = vpop.f32.mrb[58].mxu1 }
 0x303   : > { %v3831_v22 = vadd.f32 %v5455_v17, %v3799_v30  ;;  %v3762_v39 = vmul.f32 %v5143_v5, %v6871_v45  ;;  %v3699_v9 = vpop.f32.mrb[59].mxu1 }
 0x304   : > { %v3830_v33 = vadd.f32 %v5456_v38, %v3798_v62  ;;  %v3761_v28 = vmul.f32 %v6871_v45, %v3699_v9 }
 0x305   : > { %3863 = vst.msk [vmem:[%s6886_s22 + $0xc8] sm:$0xff] %vm680_vm3, %v3831_v22  ;;  %v3801_v7 = vadd.f32 %v6876_v24, %v3762_v39 }
 0x306   : > { %3862 = vst.msk [vmem:[%s6886_s22 + $0xc0] sm:$0xff] %vm680_vm3, %v3830_v33  ;;  %v3800_v20 = vadd.f32 %v6876_v24, %v3761_v28  ;;  %v5146_v43 = vpop.f32.mrb[60].mxu1 }
 0x307   : > { %v3833_v21 = vadd.f32 %v5457_v36, %v3801_v7  ;;  %v3764_v50 = vmul.f32 %v5146_v43, %v6871_v45  ;;  %v3709_v19 = vpop.f32.mrb[61].mxu1 }
 0x308   : > { %v3832_v31 = vadd.f32 %v5458_v59, %v3800_v20  ;;  %v3763_v2 = vmul.f32 %v6871_v45, %v3709_v19 }
 0x309   : > { %3865 = vst.msk [vmem:[%s6886_s22 + $0xd8] sm:$0xff] %vm680_vm3, %v3833_v21  ;;  %v3803_v8 = vadd.f32 %v6876_v24, %v3764_v50 }
 0x30a   : > { %3864 = vst.msk [vmem:[%s6886_s22 + $0xd0] sm:$0xff] %vm680_vm3, %v3832_v31  ;;  %v3802_v18 = vadd.f32 %v6876_v24, %v3763_v2  ;;  %v5149_v16 = vpop.f32.mrb[62].mxu1 }
 0x30b   : > { %v3835_v54 = vadd.f32 %v5459_v35, %v3803_v8  ;;  %v3766_v44 = vmul.f32 %v5149_v16, %v6871_v45  ;;  %v3719_v1 = vpop.f32.mrb[63].mxu1 }
 0x30c   : > { %v3834_v52 = vadd.f32 %v5460_v3, %v3802_v18  ;;  %v3765_v40 = vmul.f32 %v6871_v45, %v3719_v1 }
 0x30d   : > { %3867 = vst.msk [vmem:[%s6886_s22 + $0xe8] sm:$0xff] %vm680_vm3, %v3835_v54  ;;  %v3805_v41 = vadd.f32 %v6876_v24, %v3766_v44 }
 0x30e   : > { %3866 = vst.msk [vmem:[%s6886_s22 + $0xe0] sm:$0xff] %vm680_vm3, %v3834_v52  ;;  %v3804_v15 = vadd.f32 %v6876_v24, %v3765_v40 }
 0x30f   : > { %v3837_v56 = vadd.f32 %v5461_v13, %v3805_v41 }
 0x310   : > { %v3836_v55 = vadd.f32 %v5462_v25, %v3804_v15 }
 0x311   : > { %3869 = vst.msk [vmem:[%s6886_s22 + $0xf8] sm:$0xff] %vm680_vm3, %v3837_v56 }
 0x312   : > { %3868 = vst.msk [vmem:[%s6886_s22 + $0xf0] sm:$0xff] %vm680_vm3, %v3836_v55 }
 0x313 PF: > { %s17_s26 = sadd.s32 1, %s5485_s26   ;;  %s7239_s24 = smov %s5481_s25 }
 0x314   : > { %p14_p5 = scmp.ge.s32.totalorder %s17_s26, 4   ;;  %s7240_s25 = smov %s7242_s27 }
 0x316   :  { %16 = sbr.rel (!%p14_p5) target bundleno = 2 (0x2), region = 89 }

</bundles_post_ra>
